<compile_context>
chip_gen: v7x
topology: tpu7x:2x2x1
jax: 0.10.0
libtpu: 0.0.40
codegen_flags: <defaults>
</compile_context>

<pallas_src>
import jax
import jax.numpy as jnp
from jax.experimental import pallas as pl
from jax.experimental.pallas import tpu as pltpu


# ------------------------------ fused kernel ------------------------------- #

def _make_fused_kernel(L, T, B, H):
    """Fused LSTMDate forward for static (num_layers L, T, B, H).

    Inputs (all VMEM, whole-array):
      x_tm      (T*B, In)      time-major flattened input
      wih0_g    (In, 4*L*H)    layer-0 input weights, gate-grouped columns, g x2
      b_full    (1, 4*L*H)     all layers' biases in gate-grouped columns, g x2
      w_blk     (L*H, 4*L*H)   block [[Whh_l on (l,l)], [Wih_{l+1} on (l,l+1)]],
                               gate-grouped columns, g-gate columns pre-scaled x2
      q, wq1, bq1, wq2, bq2, w3q, w3h, b3, w4, b4   (head weights, pre-transposed)
    Output: out (B, output_size)
    """
    LH = L * H

    def kernel(x_ref, wih0_ref, bfull_ref, wblk_ref, q_ref,
               wq1_ref, bq1_ref, wq2_ref, bq2_ref,
               w3q_ref, w3h_ref, b3_ref, w4_ref, b4_ref, out_ref):
        # Hoisted input projection + biases for ALL layers (off the serial chain):
        #   layer-0 columns = x_t @ Wih0 + b0 ; layer>=1 columns = b_l (broadcast).
        gx = (jnp.dot(x_ref[...], wih0_ref[...],
                      preferred_element_type=jnp.float32)
              + bfull_ref[...])                                   # (T*B, 4LH)

        wblk = wblk_ref[...]                                      # (LH, 4LH)

        h_all = jnp.zeros((B, LH), jnp.float32)                   # packed per-layer h
        c_all = jnp.zeros((B, LH), jnp.float32)                   # packed per-layer c

        # Wavefront: at step s, layer l processes timestep s-l (if valid).
        for s in range(T + L - 1):
            t0 = min(s, T - 1)        # stale x rows for finished layer 0 are ignored
            gates = (jnp.dot(h_all, wblk, preferred_element_type=jnp.float32)
                     + gx[t0 * B:(t0 + 1) * B, :])                # (B, 4LH), 1 MXU push
            sig = jax.nn.sigmoid(gates)                           # 1 EUP push, all layers
            i_a = sig[:, 0:LH]
            f_a = sig[:, LH:2 * LH]
            g_a = 2.0 * sig[:, 2 * LH:3 * LH] - 1.0               # tanh via scaled sigmoid
            o_a = sig[:, 3 * LH:4 * LH]
            c_new = f_a * c_all + i_a * g_a
            h_new = o_a * jnp.tanh(c_new)                         # 1 EUP push, all layers
            if s < L - 1:
                # Ramp-up: layers l > s have not started yet; keep their h/c at 0.
                lane = jax.lax.broadcasted_iota(jnp.int32, (B, LH), 1)
                keep = lane < (s + 1) * H
                c_new = jnp.where(keep, c_new, 0.0)
                h_new = jnp.where(keep, h_new, 0.0)
            c_all = c_new
            h_all = h_new

        h_last = h_all[:, (L - 1) * H:LH]                         # top layer, t = T-1

        # ---------------------------- head ---------------------------- #
        # fc_q: Linear -> ReLU -> Linear
        q = q_ref[...]
        qe = jnp.maximum(
            jnp.dot(q, wq1_ref[...], preferred_element_type=jnp.float32)
            + bq1_ref[...], 0.0)
        qe = (jnp.dot(qe, wq2_ref[...], preferred_element_type=jnp.float32)
              + bq2_ref[...])

        # fc: Linear(2H -> H) -> ReLU -> Linear(H -> out), concat as split matmul:
        #   cat([q_enc, h_last]) @ W3^T = q_enc @ W3[:, :H]^T + h_last @ W3[:, H:]^T
        hid = (jnp.dot(qe, w3q_ref[...], preferred_element_type=jnp.float32)
               + jnp.dot(h_last, w3h_ref[...], preferred_element_type=jnp.float32)
               + b3_ref[...])
        hid = jnp.maximum(hid, 0.0)
        out_ref[...] = (jnp.dot(hid, w4_ref[...], preferred_element_type=jnp.float32)
                        + b4_ref[...])

    return kernel


# ------------------------------ JAX wrapper -------------------------------- #

def _vmem_spec():
    return pl.BlockSpec(memory_space=pltpu.MemorySpace.VMEM)


def lstm_date_forward(params, x, q):
    """x: (B, T, input_size) batch-first; q: (B, query_size)."""
    B, T, In = x.shape
    H = params["hidden_size"]
    L = len(params["lstm"])
    output_size = params["output_size"]
    LH = L * H

    def scale_g(w4h):
        # Pre-scale the g-gate pre-activation by 2 so tanh(x) == 2*sigmoid(2x)-1.
        return w4h.at[..., 2 * H:3 * H].multiply(2.0)

    # Pack LSTM weights into wavefront / gate-grouped layout (tiny one-time XLA
    # ops outside the kernel; cache these in a real deployment).
    w_blk = jnp.zeros((LH, 4 * LH), jnp.float32)
    b_full = jnp.zeros((1, 4 * LH), jnp.float32)
    wih0_g = jnp.zeros((In, 4 * LH), jnp.float32)
    for l, (wih_t, whh_t, b) in enumerate(params["lstm"]):
        wih_s, whh_s, b_s = scale_g(wih_t), scale_g(whh_t), scale_g(b)
        for gt in range(4):                      # gate-grouped column layout
            col = gt * LH + l * H
            src = slice(gt * H, (gt + 1) * H)
            w_blk = w_blk.at[l * H:(l + 1) * H, col:col + H].set(whh_s[:, src])
            b_full = b_full.at[:, col:col + H].set(b_s[:, src])
            if l == 0:
                wih0_g = wih0_g.at[:, col:col + H].set(wih_s[:, src])
            else:
                w_blk = w_blk.at[(l - 1) * H:l * H, col:col + H].set(wih_s[:, src])

    # Time-major flattened input (rows t*B + b), done once outside the kernel.
    x_tm = jnp.transpose(x, (1, 0, 2)).reshape(T * B, In)

    inputs = (x_tm, wih0_g, b_full, w_blk, q, *params["head"])

    kernel = _make_fused_kernel(L, T, B, H)
    return pl.pallas_call(
        kernel,
        out_shape=jax.ShapeDtypeStruct((B, output_size), jnp.float32),
        in_specs=[_vmem_spec()] * len(inputs),
        out_specs=_vmem_spec(),
    )(*inputs)


# --------------------------- pure-JAX reference ----------------------------- #

def lstm_date_reference(params, x, q):
    B, T, _ = x.shape
    H = params["hidden_size"]
    seq = x
    for (wih_t, whh_t, b) in params["lstm"]:
        h = jnp.zeros((B, H), jnp.float32)
        c = jnp.zeros((B, H), jnp.float32)
        outs = []
        for t in range(T):
            gates = seq[:, t, :] @ wih_t + h @ whh_t + b
            i = jax.nn.sigmoid(gates[:, 0:H])
            f = jax.nn.sigmoid(gates[:, H:2 * H])
            g = jnp.tanh(gates[:, 2 * H:3 * H])
            o = jax.nn.sigmoid(gates[:, 3 * H:4 * H])
            c = f * c + i * g
            h = o * jnp.tanh(c)
            outs.append(h)
        seq = jnp.stack(outs, axis=1)
    h_last = seq[:, -1, :]
    (wq1, bq1, wq2, bq2, w3q, w3h, b3, w4, b4) = params["head"]
    q_enc = jnp.maximum(q @ wq1 + bq1, 0.0) @ wq2 + bq2
    hid = jnp.maximum(q_enc @ w3q + h_last @ w3h + b3, 0.0)
    return hid @ w4 + b4


# --------------------------- parameter construction ------------------------- #

def init_params(key, input_size, hidden_size, num_layers, output_size, query_size):
    H = hidden_size

    def unif(key, shape, fan_in):
        k = 1.0 / jnp.sqrt(jnp.float32(fan_in))
        return jax.random.uniform(key, shape, jnp.float32, minval=-k, maxval=k)

    keys = iter(jax.random.split(key, 4 * num_layers + 8))

    # nn.LSTM init: U(-1/sqrt(H), 1/sqrt(H)) for all weights/biases.
    lstm_layers = []
    for layer in range(num_layers):
        in_l = input_size if layer == 0 else H
        w_ih = unif(next(keys), (4 * H, in_l), H)
        w_hh = unif(next(keys), (4 * H, H), H)
        b_ih = unif(next(keys), (4 * H,), H)
        b_hh = unif(next(keys), (4 * H,), H)
        lstm_layers.append((w_ih.T,                              # (in_l, 4H)
                            w_hh.T,                              # (H, 4H)
                            (b_ih + b_hh).reshape(1, 4 * H)))    # (1, 4H)

    # nn.Linear init: U(-1/sqrt(in_features), 1/sqrt(in_features)).
    # fc_q: Linear(query_size -> H), ReLU, Linear(H -> H)
    wq1 = unif(next(keys), (H, query_size), query_size)
    bq1 = unif(next(keys), (H,), query_size)
    wq2 = unif(next(keys), (H, H), H)
    bq2 = unif(next(keys), (H,), H)

    # fc: Linear(2H -> H), ReLU, Linear(H -> output_size)
    w3 = unif(next(keys), (H, 2 * H), 2 * H)
    b3 = unif(next(keys), (H,), 2 * H)
    w4 = unif(next(keys), (output_size, H), H)
    b4 = unif(next(keys), (output_size,), H)

    head = (
        wq1.T, bq1.reshape(1, H),
        wq2.T, bq2.reshape(1, H),
        w3[:, :H].T,          # multiplies q_enc   (H, H)
        w3[:, H:].T,          # multiplies h_last  (H, H)
        b3.reshape(1, H),
        w4.T, b4.reshape(1, output_size),
    )

    return {"lstm": lstm_layers, "head": head,
            "output_size": output_size, "hidden_size": H}


# ----------------------------------- main ----------------------------------- #

if __name__ == "__main__":
    input_size, hidden_size, num_layers = 4, 32, 2
    output_size, query_size = 4, 6
    B, T = 2, 8

    key = jax.random.PRNGKey(0)
    k_x, k_q, k_p = jax.random.split(key, 3)

    x = jax.random.normal(k_x, (B, T, input_size), jnp.float32)
    q = jax.random.normal(k_q, (B, query_size), jnp.float32)

    params = init_params(k_p, input_size, hidden_size, num_layers,
                         output_size, query_size)

    out = lstm_date_forward(params, x, q)
    jax.block_until_ready(out)
    assert out.shape == (B, output_size)

    ref = lstm_date_reference(params, x, q)
    jax.block_until_ready(ref)
    # tanh -> 2*sigmoid(2x)-1 rewrite introduces sub-1e-5 drift vs jnp.tanh.
    assert jnp.allclose(out, ref, rtol=1e-3, atol=5e-4), (out, ref)

    print("KERNEL_OK")
</pallas_src>

<mosaic_0001>
module attributes {stable_mosaic.version = 11 : i64} {
  func.func @kernel(%arg0: memref<16x4xf32, #tpu.memory_space<vmem>>, %arg1: memref<4x256xf32, #tpu.memory_space<vmem>>, %arg2: memref<1x256xf32, #tpu.memory_space<vmem>>, %arg3: memref<64x256xf32, #tpu.memory_space<vmem>>, %arg4: memref<2x6xf32, #tpu.memory_space<vmem>>, %arg5: memref<6x32xf32, #tpu.memory_space<vmem>>, %arg6: memref<1x32xf32, #tpu.memory_space<vmem>>, %arg7: memref<32x32xf32, #tpu.memory_space<vmem>>, %arg8: memref<1x32xf32, #tpu.memory_space<vmem>>, %arg9: memref<32x32xf32, #tpu.memory_space<vmem>>, %arg10: memref<32x32xf32, #tpu.memory_space<vmem>>, %arg11: memref<1x32xf32, #tpu.memory_space<vmem>>, %arg12: memref<32x4xf32, #tpu.memory_space<vmem>>, %arg13: memref<1x4xf32, #tpu.memory_space<vmem>>, %arg14: memref<2x4xf32, #tpu.memory_space<vmem>>) attributes {dimension_semantics = [], scalar_prefetch = 0 : i64, scratch_operands = 0 : i64, tpu.core_type = #tpu.core_type<tc>} {
    %c0 = arith.constant 0 : index
    %c0_0 = arith.constant 0 : index
    %0 = vector.load %arg0[%c0, %c0_0] : memref<16x4xf32, #tpu.memory_space<vmem>>, vector<16x4xf32>
    %c0_1 = arith.constant 0 : index
    %c0_2 = arith.constant 0 : index
    %1 = vector.load %arg1[%c0_1, %c0_2] : memref<4x256xf32, #tpu.memory_space<vmem>>, vector<4x256xf32>
    %cst = arith.constant dense<0.000000e+00> : vector<16x256xf32>
    %2 = tpu.matmul %0, %1, %cst {dimension_numbers = #tpu.dot_dimension_numbers<[1], [0], [0], [1], [0, 0, 1, 1], [], []>} : vector<16x4xf32>, vector<4x256xf32>, vector<16x256xf32> -> vector<16x256xf32>
    %c0_3 = arith.constant 0 : index
    %c0_4 = arith.constant 0 : index
    %3 = vector.load %arg2[%c0_3, %c0_4] : memref<1x256xf32, #tpu.memory_space<vmem>>, vector<1x256xf32>
    %4 = vector.broadcast %3 : vector<1x256xf32> to vector<16x256xf32>
    %5 = arith.addf %2, %4 : vector<16x256xf32>
    %c0_5 = arith.constant 0 : index
    %c0_6 = arith.constant 0 : index
    %6 = vector.load %arg3[%c0_5, %c0_6] : memref<64x256xf32, #tpu.memory_space<vmem>>, vector<64x256xf32>
    %cst_7 = arith.constant 0.000000e+00 : f32
    %7 = vector.broadcast %cst_7 : f32 to vector<2x64xf32>
    %cst_8 = arith.constant 0.000000e+00 : f32
    %8 = vector.broadcast %cst_8 : f32 to vector<2x64xf32>
    %cst_9 = arith.constant dense<0.000000e+00> : vector<2x256xf32>
    %9 = tpu.matmul %7, %6, %cst_9 {dimension_numbers = #tpu.dot_dimension_numbers<[1], [0], [0], [1], [0, 0, 1, 1], [], []>} : vector<2x64xf32>, vector<64x256xf32>, vector<2x256xf32> -> vector<2x256xf32>
    %10 = vector.extract_strided_slice %5 {offsets = [0, 0], sizes = [2, 256], strides = [1, 1]} : vector<16x256xf32> to vector<2x256xf32>
    %11 = arith.addf %9, %10 : vector<2x256xf32>
    %12 = arith.negf %11 : vector<2x256xf32>
    %13 = math.exp %12 : vector<2x256xf32>
    %cst_10 = arith.constant 1.000000e+00 : f32
    %14 = vector.broadcast %cst_10 : f32 to vector<2x256xf32>
    %15 = arith.addf %14, %13 : vector<2x256xf32>
    %16 = arith.divf %14, %15 : vector<2x256xf32>
    %17 = vector.extract_strided_slice %16 {offsets = [0, 0], sizes = [2, 64], strides = [1, 1]} : vector<2x256xf32> to vector<2x64xf32>
    %18 = vector.extract_strided_slice %16 {offsets = [0, 64], sizes = [2, 64], strides = [1, 1]} : vector<2x256xf32> to vector<2x64xf32>
    %19 = vector.extract_strided_slice %16 {offsets = [0, 128], sizes = [2, 64], strides = [1, 1]} : vector<2x256xf32> to vector<2x64xf32>
    %cst_11 = arith.constant 2.000000e+00 : f32
    %20 = vector.broadcast %cst_11 : f32 to vector<2x64xf32>
    %21 = arith.mulf %20, %19 : vector<2x64xf32>
    %cst_12 = arith.constant 1.000000e+00 : f32
    %22 = vector.broadcast %cst_12 : f32 to vector<2x64xf32>
    %23 = arith.subf %21, %22 : vector<2x64xf32>
    %24 = vector.extract_strided_slice %16 {offsets = [0, 192], sizes = [2, 64], strides = [1, 1]} : vector<2x256xf32> to vector<2x64xf32>
    %25 = arith.mulf %18, %8 : vector<2x64xf32>
    %26 = arith.mulf %17, %23 : vector<2x64xf32>
    %27 = arith.addf %25, %26 : vector<2x64xf32>
    %28 = math.tanh %27 : vector<2x64xf32>
    %29 = arith.mulf %24, %28 : vector<2x64xf32>
    %30 = tpu.iota {dimensions = array<i32: 1>} : vector<2x64xi32>
    %c32_i32 = arith.constant 32 : i32
    %31 = vector.broadcast %c32_i32 : i32 to vector<2x64xi32>
    %32 = arith.cmpi slt, %30, %31 : vector<2x64xi32>
    %cst_13 = arith.constant 0.000000e+00 : f32
    %33 = vector.broadcast %cst_13 : f32 to vector<2x64xf32>
    %34 = arith.select %32, %27, %33 : vector<2x64xi1>, vector<2x64xf32>
    %cst_14 = arith.constant 0.000000e+00 : f32
    %35 = vector.broadcast %cst_14 : f32 to vector<2x64xf32>
    %36 = arith.select %32, %29, %35 : vector<2x64xi1>, vector<2x64xf32>
    %cst_15 = arith.constant dense<0.000000e+00> : vector<2x256xf32>
    %37 = tpu.matmul %36, %6, %cst_15 {dimension_numbers = #tpu.dot_dimension_numbers<[1], [0], [0], [1], [0, 0, 1, 1], [], []>} : vector<2x64xf32>, vector<64x256xf32>, vector<2x256xf32> -> vector<2x256xf32>
    %38 = vector.extract_strided_slice %5 {offsets = [2, 0], sizes = [2, 256], strides = [1, 1]} : vector<16x256xf32> to vector<2x256xf32>
    %39 = arith.addf %37, %38 : vector<2x256xf32>
    %40 = arith.negf %39 : vector<2x256xf32>
    %41 = math.exp %40 : vector<2x256xf32>
    %cst_16 = arith.constant 1.000000e+00 : f32
    %42 = vector.broadcast %cst_16 : f32 to vector<2x256xf32>
    %43 = arith.addf %42, %41 : vector<2x256xf32>
    %44 = arith.divf %42, %43 : vector<2x256xf32>
    %45 = vector.extract_strided_slice %44 {offsets = [0, 0], sizes = [2, 64], strides = [1, 1]} : vector<2x256xf32> to vector<2x64xf32>
    %46 = vector.extract_strided_slice %44 {offsets = [0, 64], sizes = [2, 64], strides = [1, 1]} : vector<2x256xf32> to vector<2x64xf32>
    %47 = vector.extract_strided_slice %44 {offsets = [0, 128], sizes = [2, 64], strides = [1, 1]} : vector<2x256xf32> to vector<2x64xf32>
    %cst_17 = arith.constant 2.000000e+00 : f32
    %48 = vector.broadcast %cst_17 : f32 to vector<2x64xf32>
    %49 = arith.mulf %48, %47 : vector<2x64xf32>
    %cst_18 = arith.constant 1.000000e+00 : f32
    %50 = vector.broadcast %cst_18 : f32 to vector<2x64xf32>
    %51 = arith.subf %49, %50 : vector<2x64xf32>
    %52 = vector.extract_strided_slice %44 {offsets = [0, 192], sizes = [2, 64], strides = [1, 1]} : vector<2x256xf32> to vector<2x64xf32>
    %53 = arith.mulf %46, %34 : vector<2x64xf32>
    %54 = arith.mulf %45, %51 : vector<2x64xf32>
    %55 = arith.addf %53, %54 : vector<2x64xf32>
    %56 = math.tanh %55 : vector<2x64xf32>
    %57 = arith.mulf %52, %56 : vector<2x64xf32>
    %cst_19 = arith.constant dense<0.000000e+00> : vector<2x256xf32>
    %58 = tpu.matmul %57, %6, %cst_19 {dimension_numbers = #tpu.dot_dimension_numbers<[1], [0], [0], [1], [0, 0, 1, 1], [], []>} : vector<2x64xf32>, vector<64x256xf32>, vector<2x256xf32> -> vector<2x256xf32>
    %59 = vector.extract_strided_slice %5 {offsets = [4, 0], sizes = [2, 256], strides = [1, 1]} : vector<16x256xf32> to vector<2x256xf32>
    %60 = arith.addf %58, %59 : vector<2x256xf32>
    %61 = arith.negf %60 : vector<2x256xf32>
    %62 = math.exp %61 : vector<2x256xf32>
    %cst_20 = arith.constant 1.000000e+00 : f32
    %63 = vector.broadcast %cst_20 : f32 to vector<2x256xf32>
    %64 = arith.addf %63, %62 : vector<2x256xf32>
    %65 = arith.divf %63, %64 : vector<2x256xf32>
    %66 = vector.extract_strided_slice %65 {offsets = [0, 0], sizes = [2, 64], strides = [1, 1]} : vector<2x256xf32> to vector<2x64xf32>
    %67 = vector.extract_strided_slice %65 {offsets = [0, 64], sizes = [2, 64], strides = [1, 1]} : vector<2x256xf32> to vector<2x64xf32>
    %68 = vector.extract_strided_slice %65 {offsets = [0, 128], sizes = [2, 64], strides = [1, 1]} : vector<2x256xf32> to vector<2x64xf32>
    %cst_21 = arith.constant 2.000000e+00 : f32
    %69 = vector.broadcast %cst_21 : f32 to vector<2x64xf32>
    %70 = arith.mulf %69, %68 : vector<2x64xf32>
    %cst_22 = arith.constant 1.000000e+00 : f32
    %71 = vector.broadcast %cst_22 : f32 to vector<2x64xf32>
    %72 = arith.subf %70, %71 : vector<2x64xf32>
    %73 = vector.extract_strided_slice %65 {offsets = [0, 192], sizes = [2, 64], strides = [1, 1]} : vector<2x256xf32> to vector<2x64xf32>
    %74 = arith.mulf %67, %55 : vector<2x64xf32>
    %75 = arith.mulf %66, %72 : vector<2x64xf32>
    %76 = arith.addf %74, %75 : vector<2x64xf32>
    %77 = math.tanh %76 : vector<2x64xf32>
    %78 = arith.mulf %73, %77 : vector<2x64xf32>
    %cst_23 = arith.constant dense<0.000000e+00> : vector<2x256xf32>
    %79 = tpu.matmul %78, %6, %cst_23 {dimension_numbers = #tpu.dot_dimension_numbers<[1], [0], [0], [1], [0, 0, 1, 1], [], []>} : vector<2x64xf32>, vector<64x256xf32>, vector<2x256xf32> -> vector<2x256xf32>
    %80 = vector.extract_strided_slice %5 {offsets = [6, 0], sizes = [2, 256], strides = [1, 1]} : vector<16x256xf32> to vector<2x256xf32>
    %81 = arith.addf %79, %80 : vector<2x256xf32>
    %82 = arith.negf %81 : vector<2x256xf32>
    %83 = math.exp %82 : vector<2x256xf32>
    %cst_24 = arith.constant 1.000000e+00 : f32
    %84 = vector.broadcast %cst_24 : f32 to vector<2x256xf32>
    %85 = arith.addf %84, %83 : vector<2x256xf32>
    %86 = arith.divf %84, %85 : vector<2x256xf32>
    %87 = vector.extract_strided_slice %86 {offsets = [0, 0], sizes = [2, 64], strides = [1, 1]} : vector<2x256xf32> to vector<2x64xf32>
    %88 = vector.extract_strided_slice %86 {offsets = [0, 64], sizes = [2, 64], strides = [1, 1]} : vector<2x256xf32> to vector<2x64xf32>
    %89 = vector.extract_strided_slice %86 {offsets = [0, 128], sizes = [2, 64], strides = [1, 1]} : vector<2x256xf32> to vector<2x64xf32>
    %cst_25 = arith.constant 2.000000e+00 : f32
    %90 = vector.broadcast %cst_25 : f32 to vector<2x64xf32>
    %91 = arith.mulf %90, %89 : vector<2x64xf32>
    %cst_26 = arith.constant 1.000000e+00 : f32
    %92 = vector.broadcast %cst_26 : f32 to vector<2x64xf32>
    %93 = arith.subf %91, %92 : vector<2x64xf32>
    %94 = vector.extract_strided_slice %86 {offsets = [0, 192], sizes = [2, 64], strides = [1, 1]} : vector<2x256xf32> to vector<2x64xf32>
    %95 = arith.mulf %88, %76 : vector<2x64xf32>
    %96 = arith.mulf %87, %93 : vector<2x64xf32>
    %97 = arith.addf %95, %96 : vector<2x64xf32>
    %98 = math.tanh %97 : vector<2x64xf32>
    %99 = arith.mulf %94, %98 : vector<2x64xf32>
    %cst_27 = arith.constant dense<0.000000e+00> : vector<2x256xf32>
    %100 = tpu.matmul %99, %6, %cst_27 {dimension_numbers = #tpu.dot_dimension_numbers<[1], [0], [0], [1], [0, 0, 1, 1], [], []>} : vector<2x64xf32>, vector<64x256xf32>, vector<2x256xf32> -> vector<2x256xf32>
    %101 = vector.extract_strided_slice %5 {offsets = [8, 0], sizes = [2, 256], strides = [1, 1]} : vector<16x256xf32> to vector<2x256xf32>
    %102 = arith.addf %100, %101 : vector<2x256xf32>
    %103 = arith.negf %102 : vector<2x256xf32>
    %104 = math.exp %103 : vector<2x256xf32>
    %cst_28 = arith.constant 1.000000e+00 : f32
    %105 = vector.broadcast %cst_28 : f32 to vector<2x256xf32>
    %106 = arith.addf %105, %104 : vector<2x256xf32>
    %107 = arith.divf %105, %106 : vector<2x256xf32>
    %108 = vector.extract_strided_slice %107 {offsets = [0, 0], sizes = [2, 64], strides = [1, 1]} : vector<2x256xf32> to vector<2x64xf32>
    %109 = vector.extract_strided_slice %107 {offsets = [0, 64], sizes = [2, 64], strides = [1, 1]} : vector<2x256xf32> to vector<2x64xf32>
    %110 = vector.extract_strided_slice %107 {offsets = [0, 128], sizes = [2, 64], strides = [1, 1]} : vector<2x256xf32> to vector<2x64xf32>
    %cst_29 = arith.constant 2.000000e+00 : f32
    %111 = vector.broadcast %cst_29 : f32 to vector<2x64xf32>
    %112 = arith.mulf %111, %110 : vector<2x64xf32>
    %cst_30 = arith.constant 1.000000e+00 : f32
    %113 = vector.broadcast %cst_30 : f32 to vector<2x64xf32>
    %114 = arith.subf %112, %113 : vector<2x64xf32>
    %115 = vector.extract_strided_slice %107 {offsets = [0, 192], sizes = [2, 64], strides = [1, 1]} : vector<2x256xf32> to vector<2x64xf32>
    %116 = arith.mulf %109, %97 : vector<2x64xf32>
    %117 = arith.mulf %108, %114 : vector<2x64xf32>
    %118 = arith.addf %116, %117 : vector<2x64xf32>
    %119 = math.tanh %118 : vector<2x64xf32>
    %120 = arith.mulf %115, %119 : vector<2x64xf32>
    %cst_31 = arith.constant dense<0.000000e+00> : vector<2x256xf32>
    %121 = tpu.matmul %120, %6, %cst_31 {dimension_numbers = #tpu.dot_dimension_numbers<[1], [0], [0], [1], [0, 0, 1, 1], [], []>} : vector<2x64xf32>, vector<64x256xf32>, vector<2x256xf32> -> vector<2x256xf32>
    %122 = vector.extract_strided_slice %5 {offsets = [10, 0], sizes = [2, 256], strides = [1, 1]} : vector<16x256xf32> to vector<2x256xf32>
    %123 = arith.addf %121, %122 : vector<2x256xf32>
    %124 = arith.negf %123 : vector<2x256xf32>
    %125 = math.exp %124 : vector<2x256xf32>
    %cst_32 = arith.constant 1.000000e+00 : f32
    %126 = vector.broadcast %cst_32 : f32 to vector<2x256xf32>
    %127 = arith.addf %126, %125 : vector<2x256xf32>
    %128 = arith.divf %126, %127 : vector<2x256xf32>
    %129 = vector.extract_strided_slice %128 {offsets = [0, 0], sizes = [2, 64], strides = [1, 1]} : vector<2x256xf32> to vector<2x64xf32>
    %130 = vector.extract_strided_slice %128 {offsets = [0, 64], sizes = [2, 64], strides = [1, 1]} : vector<2x256xf32> to vector<2x64xf32>
    %131 = vector.extract_strided_slice %128 {offsets = [0, 128], sizes = [2, 64], strides = [1, 1]} : vector<2x256xf32> to vector<2x64xf32>
    %cst_33 = arith.constant 2.000000e+00 : f32
    %132 = vector.broadcast %cst_33 : f32 to vector<2x64xf32>
    %133 = arith.mulf %132, %131 : vector<2x64xf32>
    %cst_34 = arith.constant 1.000000e+00 : f32
    %134 = vector.broadcast %cst_34 : f32 to vector<2x64xf32>
    %135 = arith.subf %133, %134 : vector<2x64xf32>
    %136 = vector.extract_strided_slice %128 {offsets = [0, 192], sizes = [2, 64], strides = [1, 1]} : vector<2x256xf32> to vector<2x64xf32>
    %137 = arith.mulf %130, %118 : vector<2x64xf32>
    %138 = arith.mulf %129, %135 : vector<2x64xf32>
    %139 = arith.addf %137, %138 : vector<2x64xf32>
    %140 = math.tanh %139 : vector<2x64xf32>
    %141 = arith.mulf %136, %140 : vector<2x64xf32>
    %cst_35 = arith.constant dense<0.000000e+00> : vector<2x256xf32>
    %142 = tpu.matmul %141, %6, %cst_35 {dimension_numbers = #tpu.dot_dimension_numbers<[1], [0], [0], [1], [0, 0, 1, 1], [], []>} : vector<2x64xf32>, vector<64x256xf32>, vector<2x256xf32> -> vector<2x256xf32>
    %143 = vector.extract_strided_slice %5 {offsets = [12, 0], sizes = [2, 256], strides = [1, 1]} : vector<16x256xf32> to vector<2x256xf32>
    %144 = arith.addf %142, %143 : vector<2x256xf32>
    %145 = arith.negf %144 : vector<2x256xf32>
    %146 = math.exp %145 : vector<2x256xf32>
    %cst_36 = arith.constant 1.000000e+00 : f32
    %147 = vector.broadcast %cst_36 : f32 to vector<2x256xf32>
    %148 = arith.addf %147, %146 : vector<2x256xf32>
    %149 = arith.divf %147, %148 : vector<2x256xf32>
    %150 = vector.extract_strided_slice %149 {offsets = [0, 0], sizes = [2, 64], strides = [1, 1]} : vector<2x256xf32> to vector<2x64xf32>
    %151 = vector.extract_strided_slice %149 {offsets = [0, 64], sizes = [2, 64], strides = [1, 1]} : vector<2x256xf32> to vector<2x64xf32>
    %152 = vector.extract_strided_slice %149 {offsets = [0, 128], sizes = [2, 64], strides = [1, 1]} : vector<2x256xf32> to vector<2x64xf32>
    %cst_37 = arith.constant 2.000000e+00 : f32
    %153 = vector.broadcast %cst_37 : f32 to vector<2x64xf32>
    %154 = arith.mulf %153, %152 : vector<2x64xf32>
    %cst_38 = arith.constant 1.000000e+00 : f32
    %155 = vector.broadcast %cst_38 : f32 to vector<2x64xf32>
    %156 = arith.subf %154, %155 : vector<2x64xf32>
    %157 = vector.extract_strided_slice %149 {offsets = [0, 192], sizes = [2, 64], strides = [1, 1]} : vector<2x256xf32> to vector<2x64xf32>
    %158 = arith.mulf %151, %139 : vector<2x64xf32>
    %159 = arith.mulf %150, %156 : vector<2x64xf32>
    %160 = arith.addf %158, %159 : vector<2x64xf32>
    %161 = math.tanh %160 : vector<2x64xf32>
    %162 = arith.mulf %157, %161 : vector<2x64xf32>
    %cst_39 = arith.constant dense<0.000000e+00> : vector<2x256xf32>
    %163 = tpu.matmul %162, %6, %cst_39 {dimension_numbers = #tpu.dot_dimension_numbers<[1], [0], [0], [1], [0, 0, 1, 1], [], []>} : vector<2x64xf32>, vector<64x256xf32>, vector<2x256xf32> -> vector<2x256xf32>
    %164 = vector.extract_strided_slice %5 {offsets = [14, 0], sizes = [2, 256], strides = [1, 1]} : vector<16x256xf32> to vector<2x256xf32>
    %165 = arith.addf %163, %164 : vector<2x256xf32>
    %166 = arith.negf %165 : vector<2x256xf32>
    %167 = math.exp %166 : vector<2x256xf32>
    %cst_40 = arith.constant 1.000000e+00 : f32
    %168 = vector.broadcast %cst_40 : f32 to vector<2x256xf32>
    %169 = arith.addf %168, %167 : vector<2x256xf32>
    %170 = arith.divf %168, %169 : vector<2x256xf32>
    %171 = vector.extract_strided_slice %170 {offsets = [0, 0], sizes = [2, 64], strides = [1, 1]} : vector<2x256xf32> to vector<2x64xf32>
    %172 = vector.extract_strided_slice %170 {offsets = [0, 64], sizes = [2, 64], strides = [1, 1]} : vector<2x256xf32> to vector<2x64xf32>
    %173 = vector.extract_strided_slice %170 {offsets = [0, 128], sizes = [2, 64], strides = [1, 1]} : vector<2x256xf32> to vector<2x64xf32>
    %cst_41 = arith.constant 2.000000e+00 : f32
    %174 = vector.broadcast %cst_41 : f32 to vector<2x64xf32>
    %175 = arith.mulf %174, %173 : vector<2x64xf32>
    %cst_42 = arith.constant 1.000000e+00 : f32
    %176 = vector.broadcast %cst_42 : f32 to vector<2x64xf32>
    %177 = arith.subf %175, %176 : vector<2x64xf32>
    %178 = vector.extract_strided_slice %170 {offsets = [0, 192], sizes = [2, 64], strides = [1, 1]} : vector<2x256xf32> to vector<2x64xf32>
    %179 = arith.mulf %172, %160 : vector<2x64xf32>
    %180 = arith.mulf %171, %177 : vector<2x64xf32>
    %181 = arith.addf %179, %180 : vector<2x64xf32>
    %182 = math.tanh %181 : vector<2x64xf32>
    %183 = arith.mulf %178, %182 : vector<2x64xf32>
    %cst_43 = arith.constant dense<0.000000e+00> : vector<2x256xf32>
    %184 = tpu.matmul %183, %6, %cst_43 {dimension_numbers = #tpu.dot_dimension_numbers<[1], [0], [0], [1], [0, 0, 1, 1], [], []>} : vector<2x64xf32>, vector<64x256xf32>, vector<2x256xf32> -> vector<2x256xf32>
    %185 = vector.extract_strided_slice %5 {offsets = [14, 0], sizes = [2, 256], strides = [1, 1]} : vector<16x256xf32> to vector<2x256xf32>
    %186 = arith.addf %184, %185 : vector<2x256xf32>
    %187 = arith.negf %186 : vector<2x256xf32>
    %188 = math.exp %187 : vector<2x256xf32>
    %cst_44 = arith.constant 1.000000e+00 : f32
    %189 = vector.broadcast %cst_44 : f32 to vector<2x256xf32>
    %190 = arith.addf %189, %188 : vector<2x256xf32>
    %191 = arith.divf %189, %190 : vector<2x256xf32>
    %192 = vector.extract_strided_slice %191 {offsets = [0, 0], sizes = [2, 64], strides = [1, 1]} : vector<2x256xf32> to vector<2x64xf32>
    %193 = vector.extract_strided_slice %191 {offsets = [0, 64], sizes = [2, 64], strides = [1, 1]} : vector<2x256xf32> to vector<2x64xf32>
    %194 = vector.extract_strided_slice %191 {offsets = [0, 128], sizes = [2, 64], strides = [1, 1]} : vector<2x256xf32> to vector<2x64xf32>
    %cst_45 = arith.constant 2.000000e+00 : f32
    %195 = vector.broadcast %cst_45 : f32 to vector<2x64xf32>
    %196 = arith.mulf %195, %194 : vector<2x64xf32>
    %cst_46 = arith.constant 1.000000e+00 : f32
    %197 = vector.broadcast %cst_46 : f32 to vector<2x64xf32>
    %198 = arith.subf %196, %197 : vector<2x64xf32>
    %199 = vector.extract_strided_slice %191 {offsets = [0, 192], sizes = [2, 64], strides = [1, 1]} : vector<2x256xf32> to vector<2x64xf32>
    %200 = arith.mulf %193, %181 : vector<2x64xf32>
    %201 = arith.mulf %192, %198 : vector<2x64xf32>
    %202 = arith.addf %200, %201 : vector<2x64xf32>
    %203 = math.tanh %202 : vector<2x64xf32>
    %204 = arith.mulf %199, %203 : vector<2x64xf32>
    %205 = vector.extract_strided_slice %204 {offsets = [0, 32], sizes = [2, 32], strides = [1, 1]} : vector<2x64xf32> to vector<2x32xf32>
    %c0_47 = arith.constant 0 : index
    %c0_48 = arith.constant 0 : index
    %206 = vector.load %arg4[%c0_47, %c0_48] : memref<2x6xf32, #tpu.memory_space<vmem>>, vector<2x6xf32>
    %c0_49 = arith.constant 0 : index
    %c0_50 = arith.constant 0 : index
    %207 = vector.load %arg5[%c0_49, %c0_50] : memref<6x32xf32, #tpu.memory_space<vmem>>, vector<6x32xf32>
    %cst_51 = arith.constant dense<0.000000e+00> : vector<2x32xf32>
    %208 = tpu.matmul %206, %207, %cst_51 {dimension_numbers = #tpu.dot_dimension_numbers<[1], [0], [0], [1], [0, 0, 1, 1], [], []>} : vector<2x6xf32>, vector<6x32xf32>, vector<2x32xf32> -> vector<2x32xf32>
    %c0_52 = arith.constant 0 : index
    %c0_53 = arith.constant 0 : index
    %209 = vector.load %arg6[%c0_52, %c0_53] : memref<1x32xf32, #tpu.memory_space<vmem>>, vector<1x32xf32>
    %210 = vector.broadcast %209 : vector<1x32xf32> to vector<2x32xf32>
    %211 = arith.addf %208, %210 : vector<2x32xf32>
    %cst_54 = arith.constant 0.000000e+00 : f32
    %212 = vector.broadcast %cst_54 : f32 to vector<2x32xf32>
    %213 = arith.maximumf %211, %212 : vector<2x32xf32>
    %c0_55 = arith.constant 0 : index
    %c0_56 = arith.constant 0 : index
    %214 = vector.load %arg7[%c0_55, %c0_56] : memref<32x32xf32, #tpu.memory_space<vmem>>, vector<32x32xf32>
    %cst_57 = arith.constant dense<0.000000e+00> : vector<2x32xf32>
    %215 = tpu.matmul %213, %214, %cst_57 {dimension_numbers = #tpu.dot_dimension_numbers<[1], [0], [0], [1], [0, 0, 1, 1], [], []>} : vector<2x32xf32>, vector<32x32xf32>, vector<2x32xf32> -> vector<2x32xf32>
    %c0_58 = arith.constant 0 : index
    %c0_59 = arith.constant 0 : index
    %216 = vector.load %arg8[%c0_58, %c0_59] : memref<1x32xf32, #tpu.memory_space<vmem>>, vector<1x32xf32>
    %217 = vector.broadcast %216 : vector<1x32xf32> to vector<2x32xf32>
    %218 = arith.addf %215, %217 : vector<2x32xf32>
    %c0_60 = arith.constant 0 : index
    %c0_61 = arith.constant 0 : index
    %219 = vector.load %arg9[%c0_60, %c0_61] : memref<32x32xf32, #tpu.memory_space<vmem>>, vector<32x32xf32>
    %cst_62 = arith.constant dense<0.000000e+00> : vector<2x32xf32>
    %220 = tpu.matmul %218, %219, %cst_62 {dimension_numbers = #tpu.dot_dimension_numbers<[1], [0], [0], [1], [0, 0, 1, 1], [], []>} : vector<2x32xf32>, vector<32x32xf32>, vector<2x32xf32> -> vector<2x32xf32>
    %c0_63 = arith.constant 0 : index
    %c0_64 = arith.constant 0 : index
    %221 = vector.load %arg10[%c0_63, %c0_64] : memref<32x32xf32, #tpu.memory_space<vmem>>, vector<32x32xf32>
    %cst_65 = arith.constant dense<0.000000e+00> : vector<2x32xf32>
    %222 = tpu.matmul %205, %221, %cst_65 {dimension_numbers = #tpu.dot_dimension_numbers<[1], [0], [0], [1], [0, 0, 1, 1], [], []>} : vector<2x32xf32>, vector<32x32xf32>, vector<2x32xf32> -> vector<2x32xf32>
    %223 = arith.addf %220, %222 : vector<2x32xf32>
    %c0_66 = arith.constant 0 : index
    %c0_67 = arith.constant 0 : index
    %224 = vector.load %arg11[%c0_66, %c0_67] : memref<1x32xf32, #tpu.memory_space<vmem>>, vector<1x32xf32>
    %225 = vector.broadcast %224 : vector<1x32xf32> to vector<2x32xf32>
    %226 = arith.addf %223, %225 : vector<2x32xf32>
    %cst_68 = arith.constant 0.000000e+00 : f32
    %227 = vector.broadcast %cst_68 : f32 to vector<2x32xf32>
    %228 = arith.maximumf %226, %227 : vector<2x32xf32>
    %c0_69 = arith.constant 0 : index
    %c0_70 = arith.constant 0 : index
    %229 = vector.load %arg12[%c0_69, %c0_70] : memref<32x4xf32, #tpu.memory_space<vmem>>, vector<32x4xf32>
    %cst_71 = arith.constant dense<0.000000e+00> : vector<2x4xf32>
    %230 = tpu.matmul %228, %229, %cst_71 {dimension_numbers = #tpu.dot_dimension_numbers<[1], [0], [0], [1], [0, 0, 1, 1], [], []>} : vector<2x32xf32>, vector<32x4xf32>, vector<2x4xf32> -> vector<2x4xf32>
    %c0_72 = arith.constant 0 : index
    %c0_73 = arith.constant 0 : index
    %231 = vector.load %arg13[%c0_72, %c0_73] : memref<1x4xf32, #tpu.memory_space<vmem>>, vector<1x4xf32>
    %232 = vector.broadcast %231 : vector<1x4xf32> to vector<2x4xf32>
    %233 = arith.addf %230, %232 : vector<2x4xf32>
    %c0_74 = arith.constant 0 : index
    %c0_75 = arith.constant 0 : index
    %234 = vector.load %arg14[%c0_74, %c0_75] : memref<2x4xf32, #tpu.memory_space<vmem>>, vector<2x4xf32>
    tpu.vector_store %arg14[%c0_74, %c0_75], %233 {strides = array<i32>} : memref<2x4xf32, #tpu.memory_space<vmem>>, vector<2x4xf32>,
    return
  }
}

</mosaic_0001>

<bundles_post_ra>
// kernel: tpu_custom_call.1
= control target key start
LH: loop header
LB: loop body
LE: loop exit
PB: predicated region body
PF: predicated region fallthrough
CT: control target
= control target key end

     0   :  { %19 = vsyncpa [#allocation3], 0  ;;  %s2549_s0 = inlined_call_operand.vmem [shape: f32[16,4], index: 0, kind: input, shape index: {}]   ;;  %s2550_s1 = inlined_call_operand.hbm [shape: f32[4,256], index: 1, kind: input, shape index: {}]   ;;  %s2551_s2 = inlined_call_operand.vmem [shape: f32[1,256], index: 2, kind: input, shape index: {}]   ;;  %s2552_s3 = inlined_call_operand.hbm [shape: f32[64,256], index: 3, kind: input, shape index: {}]   ;;  %s2553_s4 = inlined_call_operand.hbm [shape: f32[2,6], index: 4, kind: input, shape index: {}]   ;;  %s2554_s5 = inlined_call_operand.vmem [shape: f32[6,32], index: 5, kind: input, shape index: {}]   ;;  %s2555_s6 = inlined_call_operand.hbm [shape: f32[1,32], index: 6, kind: input, shape index: {}]   ;;  %s2556_s7 = inlined_call_operand.vmem [shape: f32[32,32], index: 7, kind: input, shape index: {}]   ;;  %s2557_s8 = inlined_call_operand.vmem [shape: f32[1,32], index: 8, kind: input, shape index: {}]   ;;  %s2558_s9 = inlined_call_operand.vmem [shape: f32[32,32], index: 9, kind: input, shape index: {}]   ;;  %s2559_s10 = inlined_call_operand.hbm [shape: f32[32,32], index: 10, kind: input, shape index: {}]   ;;  %s2560_s11 = inlined_call_operand.vmem [shape: f32[1,32], index: 11, kind: input, shape index: {}]   ;;  %s2561_s12 = inlined_call_operand.vmem [shape: f32[32,4], index: 12, kind: input, shape index: {}]   ;;  %s2562_s13 = inlined_call_operand.vmem [shape: f32[1,4], index: 13, kind: input, shape index: {}]   ;;  %s2563_s14 = inlined_call_operand.hbm [shape: f32[2,4], index: 14, kind: output, shape index: {}]  }
   0x1   :  { %20 = vsyncpa [#allocation6], 0 }
   0x2   :  { %21 = vsyncpa [#allocation9], 0 }
   0x3   :  { %22 = vsyncpa [#allocation4], 0  ;;  %s2140_s29 = smov [#allocation5]   ;;  %s2000_s17 = scalar_lea.hbm %s2552_s3, 2048 }
   0x4   :  { %s42_s30 = sshll.u32 %s2140_s29, 4  ;;  %p2001_p0 = scmp.ne.s32.totalorder %s2552_s3, %s2000_s17  ;;  %s43_s30 = int_to_ptr.vmem [resolvable:$true] %s42_s30 }
   0x5   :  { %p2004_p1 = scmp.lt.u32.totalorder %s2000_s17, %s2552_s3 }
   0x7   :  { %p2006_p2 = pnand %p2004_p1, %p2001_p0 }
   0x9   :  { %2009 = shalt.err (!%p2006_p2)
}
   0xa   :  { %s2010_s22 = scalar_lea.vmem %s43_s30, 2048  ;;  %p2015_p4 = scmp.lt.s32.totalorder %s43_s30, %s43_s30 }
   0xb   :  { %p2011_p3 = scmp.ne.s32.totalorder %s43_s30, %s2010_s22  ;;  %p2016_p5 = scmp.lt.s32.totalorder %s2010_s22, %s2010_s22 }
   0xd   :  { %p2017_p6 = por %p2016_p5, %p2015_p4 }
   0xf   :  { %p2018_p7 = pnand %p2017_p6, %p2011_p3 }
  0x11   :  { %2021 = shalt.err (!%p2018_p7)
}
  0x12   :  { %s2141_s23 = smov 256   ;;  %s2142_s24 = smov 16  }
  0x13   :  { %48 = dma.hbm_to_vmem [thread:$0]  %s2552_s3, 2048, %s43_s30, [#allocation6], %s2141_s23, %s2141_s23, %s2142_s24  }
  0x14   :  { %s2143_s27 = smov [#allocation8]   ;;  %s2144_s29 = smov [#allocation2]  }
  0x15   :  { %s67_s28 = sshll.u32 %s2143_s27, 4  ;;  %s31_s15 = sshll.u32 %s2144_s29, 4  ;;  %s68_s28 = int_to_ptr.vmem [resolvable:$true] %s67_s28  ;;  %s32_s15 = int_to_ptr.vmem [resolvable:$true] %s31_s15 }
  0x16   :  { %s2022_s18 = scalar_lea.hbm %s2555_s6, 16 }
  0x17   :  { %p2023_p8 = scmp.ne.s32.totalorder %s2555_s6, %s2022_s18  ;;  %p2026_p9 = scmp.lt.u32.totalorder %s2022_s18, %s2555_s6 }
  0x19   :  { %p2028_p10 = pnand %p2026_p9, %p2023_p8 }
  0x1b   :  { %2031 = shalt.err (!%p2028_p10)
}
  0x1c   :  { %s2032_s3 = scalar_lea.vmem %s68_s28, 16  ;;  %s2036_s30 = scalar_lea.vmem %s68_s28, 32 }
  0x1d   :  { %p2033_p11 = scmp.ne.s32.totalorder %s68_s28, %s2032_s3  ;;  %p2037_p12 = scmp.lt.s32.totalorder %s68_s28, %s68_s28 }
  0x1e   :  { %p2038_p13 = scmp.lt.s32.totalorder %s2036_s30, %s2032_s3 }
  0x20   :  { %p2039_p0 = por %p2038_p13, %p2037_p12 }
  0x22   :  { %p2040_p1 = pnand %p2039_p0, %p2033_p11 }
  0x24   :  { %2043 = shalt.err (!%p2040_p1)
}
  0x25   :  { %70 = dma.hbm_to_vmem [thread:$0]  %s2555_s6, 16, %s68_s28, [#allocation9]  }
  0x26   :  { %s2044_s27 = scalar_lea.hbm %s2550_s1, 128 }
  0x27   :  { %p2045_p2 = scmp.ne.s32.totalorder %s2550_s1, %s2044_s27  ;;  %p2048_p3 = scmp.lt.u32.totalorder %s2044_s27, %s2550_s1 }
  0x29   :  { %p2050_p4 = pnand %p2048_p3, %p2045_p2 }
  0x2b   :  { %2053 = shalt.err (!%p2050_p4)
}
  0x2c   :  { %s2054_s19 = scalar_lea.vmem %s32_s15, 128  ;;  %p2059_p6 = scmp.lt.s32.totalorder %s32_s15, %s32_s15 }
  0x2d   :  { %p2055_p5 = scmp.ne.s32.totalorder %s32_s15, %s2054_s19  ;;  %p2060_p7 = scmp.lt.s32.totalorder %s2054_s19, %s2054_s19 }
  0x2f   :  { %p2061_p8 = por %p2060_p7, %p2059_p6 }
  0x31   :  { %p2062_p9 = pnand %p2061_p8, %p2055_p5 }
  0x33   :  { %2065 = shalt.err (!%p2062_p9)
}
  0x34   :  { %34 = dma.hbm_to_vmem [thread:$0]  %s2550_s1, 128, %s32_s15, [#allocation3]  }
  0x35   :  { %s2145_s20 = smov [#allocation7]   ;;  %s2146_s22 = smov [#allocation10]  }
  0x36   :  { %s55_s21 = sshll.u32 %s2145_s20, 4  ;;  %s82_s3 = sshll.u32 %s2146_s22, 4  ;;  %s56_s21 = int_to_ptr.vmem [resolvable:$true] %s55_s21  ;;  %s83_s3 = int_to_ptr.vmem [resolvable:$true] %s82_s3 }
  0x37   :  { %s2066_s24 = scalar_lea.hbm %s2553_s4, 32 }
  0x38   :  { %p2067_p10 = scmp.ne.s32.totalorder %s2553_s4, %s2066_s24  ;;  %p2070_p11 = scmp.lt.u32.totalorder %s2066_s24, %s2553_s4 }
  0x3a   :  { %p2072_p12 = pnand %p2070_p11, %p2067_p10 }
  0x3c   :  { %2075 = shalt.err (!%p2072_p12)
}
  0x3d   :  { %s2076_s1 = scalar_lea.vmem %s56_s21, 32  ;;  %p2081_p0 = scmp.lt.s32.totalorder %s56_s21, %s56_s21 }
  0x3e   :  { %p2077_p13 = scmp.ne.s32.totalorder %s56_s21, %s2076_s1  ;;  %p2082_p1 = scmp.lt.s32.totalorder %s2076_s1, %s2076_s1 }
  0x40   :  { %p2083_p2 = por %p2082_p1, %p2081_p0 }
  0x42   :  { %p2084_p3 = pnand %p2083_p2, %p2077_p13 }
  0x44   :  { %2087 = shalt.err (!%p2084_p3)
}
  0x45   :  { %58 = dma.hbm_to_vmem [thread:$0]  %s2553_s4, 32, %s56_s21, [#allocation6]  }
  0x46   :  { %s2088_s19 = scalar_lea.hbm %s2559_s10, 512 }
  0x47   :  { %p2089_p4 = scmp.ne.s32.totalorder %s2559_s10, %s2088_s19  ;;  %p2092_p5 = scmp.lt.u32.totalorder %s2088_s19, %s2559_s10 }
  0x49   :  { %p2094_p6 = pnand %p2092_p5, %p2089_p4 }
  0x4b   :  { %2097 = shalt.err (!%p2094_p6)
}
  0x4c   :  { %s2098_s30 = scalar_lea.vmem %s83_s3, 512  ;;  %p2103_p8 = scmp.lt.s32.totalorder %s83_s3, %s83_s3 }
  0x4d   :  { %p2099_p7 = scmp.ne.s32.totalorder %s83_s3, %s2098_s30  ;;  %p2104_p9 = scmp.lt.s32.totalorder %s2098_s30, %s2098_s30 }
  0x4f   :  { %p2105_p10 = por %p2104_p9, %p2103_p8 }
  0x51   :  { %p2106_p11 = pnand %p2105_p10, %p2099_p7 }
  0x53   :  { %2109 = shalt.err (!%p2106_p11)
}
  0x54   :  { %s2147_s4 = smov 128   ;;  %s2148_s21 = smov 8  }
  0x55   :  { %88 = dma.hbm_to_vmem [thread:$0]  %s2559_s10, 512, %s83_s3, [#allocation9], %s2147_s4, %s2147_s4, %s2148_s21  }
  0x56   :  { %2132 = dma.done.wait [#allocation3], 128  }
  0x57   :  { %2133 = vsyncadd [#allocation3], 4294967168 }
  0x58   :  { %2134 = dma.done.wait [#allocation6], 2080  }
  0x59   :  { %2135 = vsyncadd [#allocation6], 4294965216 }
  0x5a   :  { %2136 = dma.done.wait [#allocation9], 528  }
  0x5b   :  { %2137 = vsyncadd [#allocation9], 4294966768  ;;  %v2149_v0 = vmov 0.0   ;;  %v112_v1 = vld [vmem:[#allocation2] sm:$0xff]  ;;  %vm134_vm0 = vcmask 1043456   ;;  %v217_v2 = vld [vmem:[#allocation5 + $0x8] sm:$0xff]  ;;  %v115_v29 = vlaneseq }
  0x5c   :  { %203 = vmatprep.mubr.f32.mxu1 %v2149_v0  ;;  %416 = vmatprep.mubr.f32.mxu0 %v2149_v0  ;;  %v126_v3 = vcombine.high %v112_v1, %v112_v1  ;;  %v219_v4 = vld [vmem:[#allocation5 + $0x18] sm:$0xff]  ;;  %v216_v5 = vld [vmem:[#allocation5] sm:$0xff]  ;;  %v218_v6 = vld [vmem:[#allocation5 + $0x10] sm:$0xff]  ;;  %vm127_vm1 = vcmask 31744   ;;  %vm232_vm3 = vcmask 523264   ;;  %vm1178_vm4 = vcmask 1045504  }
  0x5d   :  { %v110_v7 = vld [vmem:[%s2549_s0] sm:$0xff]  ;;  %v2295_v8 = vpack.c.bf16 %v219_v4, %v217_v2  ;;  %v2297_v9 = vpack.c.bf16 %v218_v6, %v216_v5  ;;  %v221_v10 = vld [vmem:[#allocation5 + $0x28] sm:$0xff]  ;;  %v223_v11 = vld [vmem:[#allocation5 + $0x38] sm:$0xff]  ;;  %v116_v30 = vshrl.u32 %v115_v29, 7  ;;  %vm2151_vm5 = vmmov 0   ;;  %s2154_s18 = smov [#allocation11]  }
  0x5e   :  { %1606 = vmatprep.subr.msk.mxu1 %vm134_vm0, %v126_v3  ;;  %v2300_v12 = vpack.c.bf16 %v223_v11, %v221_v10  ;;  %v220_v13 = vld [vmem:[#allocation5 + $0x20] sm:$0xff]  ;;  %v222_v14 = vld [vmem:[#allocation5 + $0x30] sm:$0xff]  ;;  %v225_v15 = vld [vmem:[#allocation5 + $0x48] sm:$0xff]  ;;  %vm1174_vm6 = vcmask 48128   ;;  %vm1264_vm7 = vcmask 261120   ;;  %s1595_s19 = sshll.u32 %s2154_s18, 4  ;;  %s1596_s19 = int_to_ptr.vmem [resolvable:$true] %s1595_s19 }
  0x5f   :  { %1607 = vmatpush1.msk.msra.mxu1 %vm134_vm0, %v112_v1  ;;  %v227_v16 = vld [vmem:[#allocation5 + $0x58] sm:$0xff]  ;;  %1743 = vmatprep.subr.bf16.mxu0 %v2295_v8  ;;  %v2307_v17 = vpack.c.bf16 %v222_v14, %v220_v13  ;;  %v111_v18 = vld [vmem:[%s2549_s0 + $0x8] sm:$0xff]  ;;  %v224_v20 = vld [vmem:[#allocation5 + $0x40] sm:$0xff]  ;;  %v117_v31 = vsub.s32 0, %v116_v30  ;;  %v121_v34 = vsub.s32 1, %v116_v30  ;;  %v331_v1 = vand.u32 127, %v115_v29  ;;  %p2115_p13 = scmp.lt.s32.totalorder %s1596_s19, %s1596_s19 }
  0x60   :  { %1608 = vmatmul.mubr.msk.f32.vlgmr.msra.gmra.mrb[0].mxu1 %vm127_vm1, %v110_v7  ;;  %1727 = vmatprep.subr.bf16.mxu1 %v2295_v8  ;;  %v2314_v19 = vpack.c.bf16 %v227_v16, %v225_v15  ;;  %v226_v21 = vld [vmem:[#allocation5 + $0x50] sm:$0xff]  ;;  %v229_v22 = vld [vmem:[#allocation5 + $0x68] sm:$0xff]  ;;  %v231_v23 = vld [vmem:[#allocation5 + $0x78] sm:$0xff]  ;;  %vm1587_vm8 = vcmask 25600  }
  0x61   :  { %1729 = vmatpush1.bf16.msra.mxu1 %v2297_v9  ;;  %209 = vmatprep.mubr.f32.mxu1 %v2149_v0  ;;  %v2320_v24 = vpack.c.bf16 %v226_v21, %v224_v20  ;;  %v2324_v25 = vpack.c.bf16 %v231_v23, %v229_v22  ;;  %v228_v26 = vld [vmem:[#allocation5 + $0x60] sm:$0xff]  ;;  %v230_v27 = vld [vmem:[#allocation5 + $0x70] sm:$0xff]  ;;  %vm332_vm2 = vcmp.lt.s32.totalorder %v331_v1, 32 }
  0x62   :  { %1731 = vmatprep.subr.bf16.mxu1 %v2300_v12  ;;  %1745 = vmatpush1.bf16.msra.mxu0 %v2297_v9  ;;  %v2329_v28 = vpack.c.bf16 %v230_v27, %v228_v26  ;;  %v113_v32 = vld [vmem:[%s2551_s2] sm:$0x3]  ;;  %s2150_s2 = smov 64  }
  0x63   :  { %1747 = vmatprep.subr.bf16.mxu0 %v2300_v12  ;;  %v118_v36 = vrot.slane %v113_v32, %v117_v31  ;;  %v122_v37 = vrot.slane %v113_v32, %v121_v34 }
  0x64   :  { %1609 = vmatmul.mubr.msk.f32.gmra.mrb[2].mxu1 %vm127_vm1, %v111_v18 }
  0x65   :  { %1733 = vmatpush1.bf16.msra.mxu1 %v2307_v17  ;;  %300 = vmatprep.mubr.f32.mxu1 %v2149_v0 }
  0x66   :  { %1735 = vmatprep.subr.bf16.mxu1 %v2314_v19  ;;  %1749 = vmatpush1.bf16.msra.mxu0 %v2307_v17 }
  0x67   :  { %1751 = vmatprep.subr.bf16.mxu0 %v2314_v19 }
  0x69   :  { %1737 = vmatpush1.bf16.msra.mxu1 %v2320_v24 }
  0x6a   :  { %1739 = vmatprep.subr.bf16.mxu1 %v2324_v25  ;;  %1753 = vmatpush1.bf16.msra.mxu0 %v2320_v24 }
  0x6b   :  { %1755 = vmatprep.subr.bf16.mxu0 %v2324_v25 }
  0x6d   :  { %1741 = vmatpush1.bf16.msra.mxu1 %v2329_v28 }
  0x6e   :  { %1757 = vmatpush1.bf16.msra.mxu0 %v2329_v28  ;;  %1759 = vmatprep.subr.bf16.mxu1 %v2295_v8 }
  0x6f   :  { %1775 = vmatprep.subr.bf16.mxu0 %v2295_v8 }
  0x70   :  { %301 = vmatmul.mubr.f32.vlgmr.msra.gmra.mrb[4].mxu1 %v2149_v0 }
  0x71   :  { %1761 = vmatpush1.bf16.msra.mxu1 %v2297_v9  ;;  %523 = vmatprep.mubr.f32.mxu1 %v2149_v0 }
  0x72   :  { %1763 = vmatprep.subr.bf16.mxu1 %v2300_v12 }
  0x75   :  { %1765 = vmatpush1.bf16.msra.mxu1 %v2307_v17 }
  0x76   :  { %1767 = vmatprep.subr.bf16.mxu1 %v2314_v19 }
  0x79   :  { %1769 = vmatpush1.bf16.msra.mxu1 %v2320_v24 }
  0x7a   :  { %1771 = vmatprep.subr.bf16.mxu1 %v2324_v25 }
  0x7d   :  { %1773 = vmatpush1.bf16.msra.mxu1 %v2329_v28 }
  0x7e   :  { %1791 = vmatprep.subr.bf16.mxu1 %v2295_v8 }
 0x133   :  { %v205_v33 = vpop.f32.mrb[0].mxu1 }
 0x134   :  { %v207_v35 = vpop.f32.mrb[1].mxu1  ;;  %v2355_v42 = vadd.f32 %v205_v33, %v118_v36 }
 0x135   :  { %v2357_v43 = vadd.f32 %v207_v35, %v122_v37 }
 0x136   :  { %v345_v6 = vrot.slane %v2355_v42, 2 }
 0x137   :  { %v211_v38 = vpop.f32.mrb[2].mxu1  ;;  %v346_v10 = vrot.slane %v2357_v43, 2 }
 0x138   :  { %v2351_v39 = vadd.f32 %v211_v38, %v118_v36  ;;  %v213_v40 = vpop.f32.mrb[3].mxu1  ;;  %v453_v38 = vrot.slane %v2355_v42, 4 }
 0x139   :  { %v2353_v41 = vadd.f32 %v213_v40, %v122_v37 }
 0x143   :  { %v302_v44 = vpop.f32.mrb[4].mxu1 }
 0x144   :  { %v303_v45 = vadd.f32 %v302_v44, %v2355_v42  ;;  %v304_v46 = vpop.f32.mrb[5].mxu1  ;;  %v454_v44 = vrot.slane %v2357_v43, 4 }
 0x145   :  { %v305_v47 = vadd.f32 %v304_v46, %v2357_v43 }
 0x146   :  { %v1610_v48 = vmul.f32 -1.442695, %v303_v45 }
 0x147   :  { %v1611_v49 = vmul.f32 -1.442695, %v305_v47 }
 0x148   :  { %1910 = vpow2.f32 %v1610_v48 }
 0x149   :  { %1912 = vpow2.f32 %v1611_v49 }
 0x152   :  { %v1911_v50 = vpop.eup %1910 }
 0x153   :  { %v1913_v51 = vpop.eup %1912  ;;  %v313_v53 = vadd.f32 1.0, %v1911_v50 }
 0x154   :  { %v314_v52 = vadd.f32 1.0, %v1913_v51 }
 0x156   :  { %1914 = vrcp.f32 %v314_v52 }
 0x157   :  { %1916 = vrcp.f32 %v313_v53 }
 0x160   :  { %v1915_v54 = vpop.eup %1914 }
 0x161   :  { %v319_v55 = vmul.f32 2.0, %v1915_v54  ;;  %v1917_v57 = vpop.eup %1916 }
 0x162   :  { %v321_v59 = vmul.f32 0.0, %v1917_v57 }
 0x163   :  { %v1612_v56 = vadd.f32 -1.0, %v319_v55 }
 0x165   :  { %v322_v58 = vmul.f32 %v1917_v57, %v1612_v56 }
 0x167   :  { %324 = vrot.lane.b32.xlu0 %v322_v58, %s2150_s2 }
 0x1d9   :  { %v325_v60 = vpop.permute.xlu0 %324 }
 0x1da   :  { %v327_v61 = vadd.f32 %v325_v60, %v321_v59 }
 0x1dc   :  { %1918 = vtanh.f32 %v327_v61  ;;  %334 = vrot.lane.b32.xlu1 %v327_v61, %s2150_s2 }
 0x1e6   :  { %v1919_v62 = vpop.eup %1918 }
 0x1e7   :  { %v329_v63 = vmul.f32 %v1919_v62, %v1915_v54 }
 0x1e9   :  { %339 = vrot.lane.b32.xlu0 %v329_v63, %s2150_s2 }
 0x24e   :  { %v335_v2 = vpop.permute.xlu1 %334 }
 0x24f   :  { %v337_v3 = vsel %vm332_vm2, %v335_v2, 0.0  ;;  %v556_v2 = vrot.slane %v2355_v42, 6 }
 0x250   :  { %438 = vrot.lane.b32.xlu1 %v337_v3, %s2150_s2 }
 0x25b   :  { %v340_v4 = vpop.permute.xlu0 %339 }
 0x25c   :  { %v342_v5 = vsel %vm332_vm2, %v340_v4, 0.0  ;;  %v557_v4 = vrot.slane %v2357_v43, 6 }
 0x25d   :  { %1613 = vmatmul.mubr.msk.f32.vlgmr.msra.gmra.mrb[0].mxu0 %vm232_vm3, %v342_v5 }
 0x25e   :  { %1777 = vmatpush1.bf16.msra.mxu0 %v2297_v9  ;;  %626 = vmatprep.mubr.f32.mxu0 %v2149_v0 }
 0x25f   :  { %1779 = vmatprep.subr.bf16.mxu0 %v2300_v12 }
 0x262   :  { %1781 = vmatpush1.bf16.msra.mxu0 %v2307_v17 }
 0x263   :  { %1783 = vmatprep.subr.bf16.mxu0 %v2314_v19 }
 0x266   :  { %1785 = vmatpush1.bf16.msra.mxu0 %v2320_v24 }
 0x267   :  { %1787 = vmatprep.subr.bf16.mxu0 %v2324_v25 }
 0x26a   :  { %1789 = vmatpush1.bf16.msra.mxu0 %v2329_v28 }
 0x26b   :  { %1807 = vmatprep.subr.bf16.mxu0 %v2295_v8 }
 0x2c2   :  { %v439_v31 = vpop.permute.xlu1 %438 }
 0x330   :  { %v418_v7 = vpop.f32.mrb[0].mxu0 }
 0x331   :  { %v419_v11 = vadd.f32 %v418_v7, %v345_v6  ;;  %v420_v13 = vpop.f32.mrb[1].mxu0 }
 0x332   :  { %v421_v14 = vadd.f32 %v420_v13, %v346_v10 }
 0x333   :  { %v1614_v15 = vmul.f32 -1.442695, %v419_v11 }
 0x334   :  { %v1615_v16 = vmul.f32 -1.442695, %v421_v14 }
 0x335   :  { %1920 = vpow2.f32 %v1614_v15 }
 0x336   :  { %1922 = vpow2.f32 %v1615_v16 }
 0x33f   :  { %v1921_v18 = vpop.eup %1920 }
 0x340   :  { %v1923_v20 = vpop.eup %1922  ;;  %v429_v22 = vadd.f32 1.0, %v1921_v18 }
 0x341   :  { %v430_v21 = vadd.f32 1.0, %v1923_v20 }
 0x343   :  { %1924 = vrcp.f32 %v430_v21 }
 0x344   :  { %1926 = vrcp.f32 %v429_v22 }
 0x34d   :  { %v1925_v23 = vpop.eup %1924 }
 0x34e   :  { %v435_v26 = vmul.f32 2.0, %v1925_v23  ;;  %v1927_v29 = vpop.eup %1926 }
 0x34f   :  { %v441_v32 = vmul.f32 %v1927_v29, %v439_v31 }
 0x350   :  { %v1616_v27 = vadd.f32 -1.0, %v435_v26 }
 0x352   :  { %v442_v30 = vmul.f32 %v1927_v29, %v1616_v27 }
 0x354   :  { %444 = vrot.lane.b32.xlu0 %v442_v30, %s2150_s2 }
 0x3c6   :  { %v445_v33 = vpop.permute.xlu0 %444 }
 0x3c7   :  { %v447_v34 = vadd.f32 %v445_v33, %v441_v32 }
 0x3c9   :  { %1928 = vtanh.f32 %v447_v34 }
 0x3d3   :  { %v1929_v35 = vpop.eup %1928 }
 0x3d4   :  { %v449_v36 = vmul.f32 %v1929_v35, %v1925_v23 }
 0x3d6   :  { %451 = vrot.lane.b32.xlu1 %v449_v36, %s2150_s2 }
 0x448   :  { %v452_v37 = vpop.permute.xlu1 %451 }
 0x449   :  { %1617 = vmatmul.mubr.msk.f32.vlgmr.msra.gmra.mrb[6].mxu1 %vm232_vm3, %v452_v37 }
 0x44a   :  { %1793 = vmatpush1.bf16.msra.mxu1 %v2297_v9  ;;  %725 = vmatprep.mubr.f32.mxu1 %v2149_v0 }
 0x44b   :  { %1795 = vmatprep.subr.bf16.mxu1 %v2300_v12 }
 0x44e   :  { %1797 = vmatpush1.bf16.msra.mxu1 %v2307_v17 }
 0x44f   :  { %1799 = vmatprep.subr.bf16.mxu1 %v2314_v19 }
 0x452   :  { %1801 = vmatpush1.bf16.msra.mxu1 %v2320_v24 }
 0x453   :  { %1803 = vmatprep.subr.bf16.mxu1 %v2324_v25 }
 0x456   :  { %1805 = vmatpush1.bf16.msra.mxu1 %v2329_v28 }
 0x457   :  { %1823 = vmatprep.subr.bf16.mxu1 %v2295_v8 }
 0x51c   :  { %v525_v40 = vpop.f32.mrb[6].mxu1 }
 0x51d   :  { %v526_v45 = vadd.f32 %v525_v40, %v453_v38  ;;  %v527_v46 = vpop.f32.mrb[7].mxu1 }
 0x51e   :  { %v528_v47 = vadd.f32 %v527_v46, %v454_v44 }
 0x51f   :  { %v1618_v48 = vmul.f32 -1.442695, %v526_v45 }
 0x520   :  { %v1619_v49 = vmul.f32 -1.442695, %v528_v47 }
 0x521   :  { %1930 = vpow2.f32 %v1618_v48 }
 0x522   :  { %1932 = vpow2.f32 %v1619_v49 }
 0x52b   :  { %v1931_v50 = vpop.eup %1930 }
 0x52c   :  { %v1933_v51 = vpop.eup %1932  ;;  %v536_v53 = vadd.f32 1.0, %v1931_v50 }
 0x52d   :  { %v537_v52 = vadd.f32 1.0, %v1933_v51 }
 0x52f   :  { %1934 = vrcp.f32 %v537_v52 }
 0x530   :  { %1936 = vrcp.f32 %v536_v53 }
 0x539   :  { %v1935_v54 = vpop.eup %1934 }
 0x53a   :  { %v542_v55 = vmul.f32 2.0, %v1935_v54  ;;  %v1937_v57 = vpop.eup %1936 }
 0x53b   :  { %v544_v59 = vmul.f32 %v1937_v57, %v447_v34 }
 0x53c   :  { %v1620_v56 = vadd.f32 -1.0, %v542_v55  ;;  %v760_v55 = vrot.slane %v2351_v39, 2 }
 0x53e   :  { %v545_v58 = vmul.f32 %v1937_v57, %v1620_v56  ;;  %v761_v57 = vrot.slane %v2353_v41, 2 }
 0x540   :  { %547 = vrot.lane.b32.xlu0 %v545_v58, %s2150_s2 }
 0x5b2   :  { %v548_v60 = vpop.permute.xlu0 %547 }
 0x5b3   :  { %v550_v61 = vadd.f32 %v548_v60, %v544_v59 }
 0x5b5   :  { %1938 = vtanh.f32 %v550_v61 }
 0x5bf   :  { %v1939_v62 = vpop.eup %1938 }
 0x5c0   :  { %v552_v63 = vmul.f32 %v1939_v62, %v1935_v54 }
 0x5c2   :  { %554 = vrot.lane.b32.xlu1 %v552_v63, %s2150_s2 }
 0x634   :  { %v555_v1 = vpop.permute.xlu1 %554 }
 0x635   :  { %1621 = vmatmul.mubr.msk.f32.vlgmr.msra.gmra.mrb[2].mxu0 %vm232_vm3, %v555_v1 }
 0x636   :  { %1809 = vmatpush1.bf16.msra.mxu0 %v2297_v9  ;;  %830 = vmatprep.mubr.f32.mxu0 %v2149_v0 }
 0x637   :  { %1811 = vmatprep.subr.bf16.mxu0 %v2300_v12 }
 0x63a   :  { %1813 = vmatpush1.bf16.msra.mxu0 %v2307_v17 }
 0x63b   :  { %1815 = vmatprep.subr.bf16.mxu0 %v2314_v19 }
 0x63e   :  { %1817 = vmatpush1.bf16.msra.mxu0 %v2320_v24 }
 0x63f   :  { %1819 = vmatprep.subr.bf16.mxu0 %v2324_v25 }
 0x642   :  { %1821 = vmatpush1.bf16.msra.mxu0 %v2329_v28 }
 0x643   :  { %1839 = vmatprep.subr.bf16.mxu0 %v2295_v8 }
 0x708   :  { %v628_v3 = vpop.f32.mrb[2].mxu0 }
 0x709   :  { %v629_v5 = vadd.f32 %v628_v3, %v556_v2  ;;  %v630_v6 = vpop.f32.mrb[3].mxu0 }
 0x70a   :  { %v631_v7 = vadd.f32 %v630_v6, %v557_v4 }
 0x70b   :  { %v1622_v10 = vmul.f32 -1.442695, %v629_v5 }
 0x70c   :  { %v1623_v11 = vmul.f32 -1.442695, %v631_v7 }
 0x70d   :  { %1940 = vpow2.f32 %v1622_v10 }
 0x70e   :  { %1942 = vpow2.f32 %v1623_v11 }
 0x717   :  { %v1941_v13 = vpop.eup %1940 }
 0x718   :  { %v1943_v14 = vpop.eup %1942  ;;  %v639_v16 = vadd.f32 1.0, %v1941_v13 }
 0x719   :  { %v640_v15 = vadd.f32 1.0, %v1943_v14 }
 0x71b   :  { %1944 = vrcp.f32 %v640_v15 }
 0x71c   :  { %1946 = vrcp.f32 %v639_v16 }
 0x725   :  { %v1945_v18 = vpop.eup %1944 }
 0x726   :  { %v645_v20 = vmul.f32 2.0, %v1945_v18  ;;  %v1947_v42 = vpop.eup %1946 }
 0x727   :  { %v647_v43 = vmul.f32 %v1947_v42, %v550_v61 }
 0x728   :  { %v1624_v21 = vadd.f32 -1.0, %v645_v20  ;;  %v863_v20 = vrot.slane %v2351_v39, 4 }
 0x72a   :  { %v648_v22 = vmul.f32 %v1947_v42, %v1624_v21  ;;  %v864_v42 = vrot.slane %v2353_v41, 4 }
 0x72c   :  { %650 = vrot.lane.b32.xlu0 %v648_v22, %s2150_s2 }
 0x79e   :  { %v651_v23 = vpop.permute.xlu0 %650 }
 0x79f   :  { %v653_v26 = vadd.f32 %v651_v23, %v647_v43 }
 0x7a1   :  { %1948 = vtanh.f32 %v653_v26 }
 0x7ab   :  { %v1949_v27 = vpop.eup %1948 }
 0x7ac   :  { %v655_v29 = vmul.f32 %v1949_v27, %v1945_v18 }
 0x7ae   :  { %657 = vrot.lane.b32.xlu1 %v655_v29, %s2150_s2 }
 0x820   :  { %v658_v30 = vpop.permute.xlu1 %657 }
 0x821   :  { %1625 = vmatmul.mubr.msk.f32.vlgmr.msra.gmra.mrb[8].mxu1 %vm232_vm3, %v658_v30 }
 0x822   :  { %1825 = vmatpush1.bf16.msra.mxu1 %v2297_v9  ;;  %933 = vmatprep.mubr.f32.mxu1 %v2149_v0 }
 0x823   :  { %1827 = vmatprep.subr.bf16.mxu1 %v2300_v12 }
 0x826   :  { %1829 = vmatpush1.bf16.msra.mxu1 %v2307_v17 }
 0x827   :  { %1831 = vmatprep.subr.bf16.mxu1 %v2314_v19 }
 0x82a   :  { %1833 = vmatpush1.bf16.msra.mxu1 %v2320_v24 }
 0x82b   :  { %1835 = vmatprep.subr.bf16.mxu1 %v2324_v25 }
 0x82e   :  { %1837 = vmatpush1.bf16.msra.mxu1 %v2329_v28 }
 0x82f   :  { %1855 = vmatprep.subr.bf16.mxu1 %v2295_v8 }
 0x8f4   :  { %v727_v31 = vpop.f32.mrb[8].mxu1 }
 0x8f5   :  { %v728_v32 = vadd.f32 %v727_v31, %v2351_v39  ;;  %v729_v33 = vpop.f32.mrb[9].mxu1 }
 0x8f6   :  { %v730_v34 = vadd.f32 %v729_v33, %v2353_v41 }
 0x8f7   :  { %v1626_v35 = vmul.f32 -1.442695, %v728_v32 }
 0x8f8   :  { %v1627_v36 = vmul.f32 -1.442695, %v730_v34 }
 0x8f9   :  { %1950 = vpow2.f32 %v1626_v35 }
 0x8fa   :  { %1952 = vpow2.f32 %v1627_v36 }
 0x903   :  { %v1951_v37 = vpop.eup %1950 }
 0x904   :  { %v1953_v38 = vpop.eup %1952  ;;  %v738_v44 = vadd.f32 1.0, %v1951_v37  ;;  %v966_v37 = vrot.slane %v2351_v39, 6 }
 0x905   :  { %v739_v40 = vadd.f32 1.0, %v1953_v38 }
 0x907   :  { %1954 = vrcp.f32 %v739_v40  ;;  %v967_v40 = vrot.slane %v2353_v41, 6  ;;  %v1338_v41 = vld [vmem:[%s2558_s9] sm:$0xff] }
 0x908   :  { %1956 = vrcp.f32 %v738_v44 }
 0x911   :  { %v1955_v45 = vpop.eup %1954 }
 0x912   :  { %v744_v46 = vmul.f32 2.0, %v1955_v45  ;;  %v1957_v8 = vpop.eup %1956 }
 0x913   :  { %v746_v49 = vmul.f32 %v1957_v8, %v653_v26 }
 0x914   :  { %v1628_v47 = vadd.f32 -1.0, %v744_v46 }
 0x916   :  { %v747_v48 = vmul.f32 %v1957_v8, %v1628_v47 }
 0x918   :  { %749 = vrot.lane.b32.xlu0 %v747_v48, %s2150_s2 }
 0x98a   :  { %v750_v50 = vpop.permute.xlu0 %749 }
 0x98b   :  { %v752_v51 = vadd.f32 %v750_v50, %v746_v49 }
 0x98d   :  { %1958 = vtanh.f32 %v752_v51 }
 0x997   :  { %v1959_v52 = vpop.eup %1958 }
 0x998   :  { %v754_v53 = vmul.f32 %v1959_v52, %v1955_v45 }
 0x99a   :  { %756 = vrot.lane.b32.xlu1 %v754_v53, %s2150_s2 }
 0xa0c   :  { %v757_v54 = vpop.permute.xlu1 %756 }
 0xa0d   :  { %1629 = vmatmul.mubr.msk.f32.vlgmr.msra.gmra.mrb[4].mxu0 %vm232_vm3, %v757_v54 }
 0xa0e   :  { %1841 = vmatpush1.bf16.msra.mxu0 %v2297_v9  ;;  %1036 = vmatprep.mubr.f32.mxu0 %v2149_v0 }
 0xa0f   :  { %1843 = vmatprep.subr.bf16.mxu0 %v2300_v12 }
 0xa12   :  { %1845 = vmatpush1.bf16.msra.mxu0 %v2307_v17 }
 0xa13   :  { %1847 = vmatprep.subr.bf16.mxu0 %v2314_v19 }
 0xa16   :  { %1849 = vmatpush1.bf16.msra.mxu0 %v2320_v24 }
 0xa17   :  { %1851 = vmatprep.subr.bf16.mxu0 %v2324_v25 }
 0xa1a   :  { %1853 = vmatpush1.bf16.msra.mxu0 %v2329_v28 }
 0xa1b   :  { %1677 = vmatprep.subr.mxu0 %v2149_v0 }
 0xae0   :  { %v832_v56 = vpop.f32.mrb[4].mxu0 }
 0xae1   :  { %v833_v58 = vadd.f32 %v832_v56, %v760_v55  ;;  %v834_v59 = vpop.f32.mrb[5].mxu0 }
 0xae2   :  { %v835_v60 = vadd.f32 %v834_v59, %v761_v57 }
 0xae3   :  { %v1630_v61 = vmul.f32 -1.442695, %v833_v58 }
 0xae4   :  { %v1631_v62 = vmul.f32 -1.442695, %v835_v60  ;;  %v1166_v60 = vld [vmem:[%s2554_s5] sm:$0x3f] }
 0xae5   :  { %1960 = vpow2.f32 %v1630_v61  ;;  %v1165_v61 = vld [vmem:[#allocation7] sm:$0x3] }
 0xae6   :  { %1962 = vpow2.f32 %v1631_v62 }
 0xaef   :  { %v1961_v63 = vpop.eup %1960 }
 0xaf0   :  { %v1963_v1 = vpop.eup %1962  ;;  %v843_v3 = vadd.f32 1.0, %v1961_v63 }
 0xaf1   :  { %v844_v2 = vadd.f32 1.0, %v1963_v1 }
 0xaf3   :  { %1964 = vrcp.f32 %v844_v2  ;;  %v1253_v2 = vld [vmem:[%s2556_s7] sm:$0xff] }
 0xaf4   :  { %1966 = vrcp.f32 %v843_v3  ;;  %v1254_v3 = vld [vmem:[%s2556_s7 + $0x8] sm:$0xff] }
 0xafd   :  { %v1965_v4 = vpop.eup %1964 }
 0xafe   :  { %v849_v5 = vmul.f32 2.0, %v1965_v4  ;;  %v1967_v7 = vpop.eup %1966 }
 0xaff   :  { %v851_v11 = vmul.f32 %v1967_v7, %v752_v51 }
 0xb00   :  { %v1632_v6 = vadd.f32 -1.0, %v849_v5 }
 0xb02   :  { %v852_v10 = vmul.f32 %v1967_v7, %v1632_v6  ;;  %v2152_v6 = vmov 0.0|0.0   ;;  %v1871_v7 = vpack.c.bf16 %v1254_v3, %v1253_v2 }
 0xb04   :  { %854 = vrot.lane.b32.xlu0 %v852_v10, %s2150_s2 }
 0xb76   :  { %v855_v13 = vpop.permute.xlu0 %854 }
 0xb77   :  { %v857_v14 = vadd.f32 %v855_v13, %v851_v11  ;;  %v1255_v11 = vld [vmem:[%s2556_s7 + $0x10] sm:$0xff]  ;;  %v1256_v13 = vld [vmem:[%s2556_s7 + $0x18] sm:$0xff] }
 0xb79   :  { %1968 = vtanh.f32 %v857_v14 }
 0xb83   :  { %v1969_v15 = vpop.eup %1968 }
 0xb84   :  { %v859_v16 = vmul.f32 %v1969_v15, %v1965_v4  ;;  %v1645_v4 = vld [vmem:[#allocation8] ss:$0 sm:$0xff]  ;;  %v1874_v15 = vpack.c.bf16 %v1256_v13, %v1255_v11 }
 0xb86   :  { %861 = vrot.lane.b32.xlu1 %v859_v16, %s2150_s2 }
 0xbf8   :  { %v862_v18 = vpop.permute.xlu1 %861 }
 0xbf9   :  { %1633 = vmatmul.mubr.msk.f32.vlgmr.msra.gmra.mrb[10].mxu1 %vm232_vm3, %v862_v18 }
 0xbfa   :  { %1857 = vmatpush1.bf16.msra.mxu1 %v2297_v9  ;;  %1135 = vmatprep.mubr.f32.mxu1 %v2149_v0 }
 0xbfb   :  { %1859 = vmatprep.subr.bf16.mxu1 %v2300_v12 }
 0xbfe   :  { %1861 = vmatpush1.bf16.msra.mxu1 %v2307_v17 }
 0xbff   :  { %1863 = vmatprep.subr.bf16.mxu1 %v2314_v19 }
 0xc02   :  { %1865 = vmatpush1.bf16.msra.mxu1 %v2320_v24 }
 0xc03   :  { %1867 = vmatprep.subr.bf16.mxu1 %v2324_v25 }
 0xc06   :  { %1869 = vmatpush1.bf16.msra.mxu1 %v2329_v28 }
 0xc07   :  { %1882 = vmatprep.subr.bf16.mxu1 %v2152_v6 }
 0xccc   :  { %v935_v21 = vpop.f32.mrb[10].mxu1 }
 0xccd   :  { %v936_v9 = vadd.f32 %v935_v21, %v863_v20  ;;  %v937_v22 = vpop.f32.mrb[11].mxu1 }
 0xcce   :  { %v938_v43 = vadd.f32 %v937_v22, %v864_v42 }
 0xccf   :  { %v1634_v23 = vmul.f32 -1.442695, %v936_v9 }
 0xcd0   :  { %v1635_v12 = vmul.f32 -1.442695, %v938_v43 }
 0xcd1   :  { %1970 = vpow2.f32 %v1634_v23 }
 0xcd2   :  { %1972 = vpow2.f32 %v1635_v12 }
 0xcdb   :  { %v1971_v17 = vpop.eup %1970 }
 0xcdc   :  { %v1973_v19 = vpop.eup %1972  ;;  %v946_v24 = vadd.f32 1.0, %v1971_v17 }
 0xcdd   :  { %v947_v26 = vadd.f32 1.0, %v1973_v19 }
 0xcdf   :  { %1974 = vrcp.f32 %v947_v26 }
 0xce0   :  { %1976 = vrcp.f32 %v946_v24 }
 0xce9   :  { %v1975_v25 = vpop.eup %1974 }
 0xcea   :  { %v952_v28 = vmul.f32 2.0, %v1975_v25  ;;  %v1977_v29 = vpop.eup %1976 }
 0xceb   :  { %v954_v31 = vmul.f32 %v1977_v29, %v857_v14 }
 0xcec   :  { %v1636_v27 = vadd.f32 -1.0, %v952_v28  ;;  %v1339_v28 = vld [vmem:[%s2558_s9 + $0x8] sm:$0xff] }
 0xcee   :  { %v955_v30 = vmul.f32 %v1977_v29, %v1636_v27  ;;  %v1342_v27 = vld [vmem:[#allocation10] sm:$0xff]  ;;  %v1883_v29 = vpack.c.bf16 %v1339_v28, %v1338_v41 }
 0xcf0   :  { %957 = vrot.lane.b32.xlu0 %v955_v30, %s2150_s2  ;;  %v1343_v30 = vld [vmem:[#allocation10 + $0x8] sm:$0xff] }
 0xd62   :  { %v958_v32 = vpop.permute.xlu0 %957 }
 0xd63   :  { %v960_v33 = vadd.f32 %v958_v32, %v954_v31  ;;  %v1340_v31 = vld [vmem:[%s2558_s9 + $0x10] sm:$0xff]  ;;  %v1877_v32 = vpack.c.bf16 %v1343_v30, %v1342_v27 }
 0xd65   :  { %1978 = vtanh.f32 %v960_v33 }
 0xd6f   :  { %v1979_v34 = vpop.eup %1978 }
 0xd70   :  { %v962_v35 = vmul.f32 %v1979_v34, %v1975_v25  ;;  %v1344_v34 = vld [vmem:[#allocation10 + $0x10] sm:$0xff] }
 0xd72   :  { %964 = vrot.lane.b32.xlu1 %v962_v35, %s2150_s2  ;;  %v1345_v35 = vld [vmem:[#allocation10 + $0x18] sm:$0xff] }
 0xde4   :  { %v965_v36 = vpop.permute.xlu1 %964 }
 0xde5   :  { %1637 = vmatmul.mubr.msk.f32.vlgmr.msra.gmra.mrb[6].mxu0 %vm232_vm3, %v965_v36 }
 0xde6   :  { %1678 = vmatpush3.msk.msra.mxu0 %vm1178_vm4, %v1166_v60  ;;  %1679 = vmatprep.mubr.msk.f32.mxu0 %vm2151_vm5, %v2149_v0 }
 0xde7   :  { %1870 = vmatprep.subr.bf16.mxu0 %v2152_v6 }
 0xde9   :  { %1680 = vmatmul.mubr.msk.f32.vlgmr.msra.gmra.mrb[8].mxu0 %vm1174_vm6, %v1165_v61 }
 0xdea   :  { %1690 = vmatprep.mubr.msk.f32.mxu0 %vm2151_vm5, %v2149_v0  ;;  %1872 = vmatpush3.bf16.msra.mxu0 %v1871_v7 }
 0xdeb   :  { %1873 = vmatprep.subr.bf16.mxu0 %v2152_v6 }
 0xdee   :  { %1875 = vmatpush3.bf16.msra.mxu0 %v1874_v15 }
 0xdef   :  { %1876 = vmatprep.subr.bf16.mxu0 %v2152_v6 }
 0xeb8   :  { %v1038_v38 = vpop.f32.mrb[6].mxu0 }
 0xeb9   :  { %v1039_v44 = vadd.f32 %v1038_v38, %v966_v37  ;;  %v1040_v45 = vpop.f32.mrb[7].mxu0  ;;  %v1648_v38 = vld [vmem:[%s2557_s8] ss:$0 sm:$0xff] }
 0xeba   :  { %v1041_v46 = vadd.f32 %v1040_v45, %v967_v40 }
 0xebb   :  { %v1638_v47 = vmul.f32 -1.442695, %v1039_v44 }
 0xebc   :  { %v1639_v8 = vmul.f32 -1.442695, %v1041_v46  ;;  %v1248_v5 = vpop.f32.mrb[8].mxu0 }
 0xebd   :  { %1980 = vpow2.f32 %v1638_v47  ;;  %v1681_v10 = vpop.f32.mrb[9].mxu0  ;;  %v1249_v14 = vadd.f32 %v1645_v4, %v1248_v5 }
 0xebe   :  { %1982 = vpow2.f32 %v1639_v8 }
 0xebf   :  { %v1252_v16 = vmax.f32 %v1249_v14, 0.0 }
 0xec1   :  { %1691 = vmatmul.mubr.msk.f32.vlgmr.msra.gmra.mrb[10].mxu0 %vm1264_vm7, %v1252_v16 }
 0xec2   :  { %1701 = vmatprep.mubr.msk.f32.mxu0 %vm2151_vm5, %v2149_v0  ;;  %1878 = vmatpush3.bf16.msra.mxu0 %v1877_v32 }
 0xec3   :  { %1879 = vmatprep.subr.bf16.mxu0 %v2152_v6 }
 0xec7   :  { %v1981_v48 = vpop.eup %1980 }
 0xec8   :  { %v1983_v49 = vpop.eup %1982  ;;  %v1049_v51 = vadd.f32 1.0, %v1981_v48 }
 0xec9   :  { %v1050_v50 = vadd.f32 1.0, %v1983_v49 }
 0xecb   :  { %1984 = vrcp.f32 %v1050_v50 }
 0xecc   :  { %1986 = vrcp.f32 %v1049_v51 }
 0xed5   :  { %v1985_v52 = vpop.eup %1984 }
 0xed6   :  { %v1055_v53 = vmul.f32 2.0, %v1985_v52  ;;  %v1987_v55 = vpop.eup %1986 }
 0xed7   :  { %v1057_v57 = vmul.f32 %v1987_v55, %v960_v33  ;;  %v1341_v33 = vld [vmem:[%s2558_s9 + $0x18] sm:$0xff]  ;;  %s2153_s9 = smov 32  }
 0xed8   :  { %v1640_v54 = vadd.f32 -1.0, %v1055_v53  ;;  %v1886_v36 = vpack.c.bf16 %v1341_v33, %v1340_v31  ;;  %v1503_v53 = vld [vmem:[%s2561_s12] sm:$0xff] }
 0xeda   :  { %v1058_v56 = vmul.f32 %v1987_v55, %v1640_v54  ;;  %v1504_v54 = vld [vmem:[%s2561_s12 + $0x8] sm:$0xff] }
 0xedb   :  { %v1889_v55 = vpack.c.bf16 %v1504_v54, %v1503_v53 }
 0xedc   :  { %1060 = vrot.lane.b32.xlu0 %v1058_v56, %s2150_s2  ;;  %v1505_v56 = vld [vmem:[%s2561_s12 + $0x10] sm:$0xff] }
 0xf4e   :  { %v1061_v58 = vpop.permute.xlu0 %1060 }
 0xf4f   :  { %v2456_v59 = vadd.f32 %v1061_v58, %v1057_v57 }
 0xf51   :  { %1988 = vtanh.f32 %v2456_v59 }
 0xf5b   :  { %v1989_v62 = vpop.eup %1988 }
 0xf5c   :  { %v1065_v63 = vmul.f32 %v1989_v62, %v1985_v52 }
 0xf5e   :  { %1067 = vrot.lane.b32.xlu1 %v1065_v63, %s2150_s2 }
 0xfd0   :  { %v1068_v1 = vpop.permute.xlu1 %1067 }
 0xfd1   :  { %1641 = vmatmul.mubr.msk.f32.vlgmr.msra.gmra.mrb[12].mxu1 %vm232_vm3, %v1068_v1  ;;  %v1653_v1 = vld [vmem:[%s2562_s13] ss:$0 sm:$0xff] }
 0xfd2   :  { %1712 = vmatprep.mubr.msk.f32.mxu1 %vm2151_vm5, %v2149_v0  ;;  %1884 = vmatpush3.bf16.msra.mxu1 %v1883_v29 }
 0xfd3   :  { %1885 = vmatprep.subr.bf16.mxu1 %v2152_v6 }
 0xfd6   :  { %1887 = vmatpush3.bf16.msra.mxu1 %v1886_v36 }
0x10a4   :  { %v1137_v18 = vpop.f32.mrb[12].mxu1 }
0x10a5   :  { %v1138_v20 = vadd.f32 %v1137_v18, %v966_v37  ;;  %v1139_v21 = vpop.f32.mrb[13].mxu1  ;;  %v1880_v37 = vpack.c.bf16 %v1345_v35, %v1344_v34 }
0x10a6   :  { %v1140_v42 = vadd.f32 %v1139_v21, %v967_v40  ;;  %v1334_v40 = vpop.f32.mrb[10].mxu0 }
0x10a7   :  { %v1642_v9 = vmul.f32 -1.442695, %v1138_v20  ;;  %1881 = vmatpush3.bf16.msra.mxu0 %v1880_v37  ;;  %v1335_v44 = vadd.f32 %v1648_v38, %v1334_v40  ;;  %v1692_v45 = vpop.f32.mrb[11].mxu0 }
0x10a8   :  { %v1643_v22 = vmul.f32 -1.442695, %v1140_v42  ;;  %1888 = vmatprep.subr.bf16.mxu0 %v2152_v6 }
0x10a9   :  { %1990 = vpow2.f32 %v1642_v9  ;;  %1713 = vmatmul.mubr.msk.f32.vlgmr.msra.gmra.mrb[14].mxu1 %vm1264_vm7, %v1335_v44 }
0x10aa   :  { %1992 = vpow2.f32 %v1643_v22 }
0x10b3   :  { %v1991_v43 = vpop.eup %1990 }
0x10b4   :  { %v1993_v23 = vpop.eup %1992  ;;  %v1148_v17 = vadd.f32 1.0, %v1991_v43 }
0x10b5   :  { %v1149_v12 = vadd.f32 1.0, %v1993_v23 }
0x10b7   :  { %1994 = vrcp.f32 %v1149_v12 }
0x10b8   :  { %1996 = vrcp.f32 %v1148_v17 }
0x10c1   :  { %v1995_v19 = vpop.eup %1994 }
0x10c2   :  { %v1154_v26 = vmul.f32 2.0, %v1995_v19  ;;  %v1997_v25 = vpop.eup %1996 }
0x10c3   :  { %v1156_v46 = vmul.f32 %v1997_v25, %v2456_v59  ;;  %v1652_v59 = vld [vmem:[%s2560_s11] ss:$0 sm:$0xff] }
0x10c4   :  { %v1644_v24 = vadd.f32 -1.0, %v1154_v26 }
0x10c6   :  { %v1157_v39 = vmul.f32 %v1997_v25, %v1644_v24 }
0x10c8   :  { %1159 = vrot.lane.b32.xlu0 %v1157_v39, %s2150_s2 }
0x113a   :  { %v1160_v47 = vpop.permute.xlu0 %1159 }
0x113b   :  { %v1162_v8 = vadd.f32 %v1160_v47, %v1156_v46 }
0x113d   :  { %1998 = vtanh.f32 %v1162_v8 }
0x1147   :  { %v1999_v48 = vpop.eup %1998 }
0x1148   :  { %v1164_v49 = vmul.f32 %v1999_v48, %v1995_v19 }
0x114a   :  { %1347 = vrot.lane.b32.xlu1 %v1164_v49, %s2153_s9 }
0x117c   :  { %v1490_v51 = vpop.f32.mrb[14].mxu1 }
0x117d   :  { %v1714_v52 = vpop.f32.mrb[15].mxu1 }
0x11bc   :  { %v1348_v50 = vpop.permute.xlu1 %1347 }
0x11bd   :  { %1702 = vmatmul.mubr.msk.f32.vlgmr.msra.gmra.mrb[12].mxu0 %vm1264_vm7, %v1348_v50 }
0x11be   :  { %1723 = vmatprep.mubr.msk.f32.mxu0 %vm2151_vm5, %v2149_v0  ;;  %1890 = vmatpush3.bf16.msra.mxu0 %v1889_v55  ;;  %v1506_v0 = vld [vmem:[%s2561_s12 + $0x18] sm:$0xff]  ;;  %s2110_s12 = scalar_lea.vmem %s1596_s19, 32 }
0x11bf   :  { %1891 = vmatprep.subr.bf16.mxu0 %v2152_v6  ;;  %v1892_v57 = vpack.c.bf16 %v1506_v0, %v1505_v56  ;;  %p2111_p12 = scmp.ne.s32.totalorder %s1596_s19, %s2110_s12  ;;  %p2116_p0 = scmp.lt.s32.totalorder %s2110_s12, %s2110_s12 }
0x11c1   :  { %p2117_p1 = por %p2116_p0, %p2115_p13 }
0x11c2   :  { %1893 = vmatpush3.bf16.msra.mxu0 %v1892_v57 }
0x11c3   :  { %p2118_p2 = pnand %p2117_p1, %p2111_p12 }
0x1290   :  { %v1417_v58 = vpop.f32.mrb[12].mxu0 }
0x1291   :  { %v1491_v60 = vadd.f32 %v1490_v51, %v1417_v58  ;;  %v1703_v61 = vpop.f32.mrb[13].mxu0 }
0x1293   :  { %v1501_v62 = vadd.f32 %v1652_v59, %v1491_v60 }
0x1295   :  { %v1502_v63 = vmax.f32 %v1501_v62, 0.0 }
0x1297   :  { %1724 = vmatmul.mubr.msk.f32.vlgmr.msra.gmra.mrb[14].mxu0 %vm1264_vm7, %v1502_v63 }
0x136a   :  { %v1583_v2 = vpop.f32.mrb[14].mxu0 }
0x136b   :  { %v1584_v3 = vadd.f32 %v1653_v1, %v1583_v2  ;;  %v1725_v4 = vpop.f32.mrb[15].mxu0 }
0x136d   :  { %1588 = vst.msk [vmem:[#allocation11] sm:$0x3] %vm1587_vm8, %v1584_v3 }
0x136e   :  { %2121 = shalt.err (!%p2118_p2)
}
0x136f   :  { %s2122_s28 = scalar_lea.hbm %s2563_s14, 32 }
0x1370   :  { %p2123_p3 = scmp.ne.s32.totalorder %s2563_s14, %s2122_s28  ;;  %p2126_p4 = scmp.lt.u32.totalorder %s2122_s28, %s2563_s14 }
0x1372   :  { %p2128_p5 = pnand %p2126_p4, %p2123_p3 }
0x1374   :  { %2131 = shalt.err (!%p2128_p5)
}
0x1375   :  { %1598 = dma.vmem_to_hbm [thread:$0]  %s1596_s19, 32, %s2563_s14, [#allocation4]  }
0x1376   :  { %2138 = dma.done.wait [#allocation4], 32  }
0x1377   :  { %2139 = vsyncadd [#allocation4], 4294967264 }
0x1378   :  { %1602 = vsyncpa [#allocation3], 1 }
0x1379   :  { %1603 = vsyncpa [#allocation6], 1 }
0x137a   :  { %1604 = vsyncpa [#allocation9], 1 }
0x137b   :  { %1605 = vsyncpa [#allocation4], 1 }

</bundles_post_ra>
